<compile_context>
chip_gen: v7x
topology: tpu7x:2x2x1
jax: 0.10.0
libtpu: 0.0.40
codegen_flags: <defaults>
</compile_context>

<pallas_src>
import functools
import math

import jax
import jax.numpy as jnp
from jax import lax
from jax.experimental import pallas as pl
from jax.experimental.pallas import tpu as pltpu

DIM = 768        # BERT hidden size used by the module
HEAD_PAD = 128   # classifier logits padded to one full lane group


# ----------------------------------------------------------------------------
# The single fused kernel: gather -> linear -> attention -> classifier MLP
# ----------------------------------------------------------------------------
def _fused_forward_kernel(ex_ref,                    # scalar prefetch (SMEM), drives index_maps
                          xemb_ref, yemb_ref,        # (1, 1, 768) bf16 gathered BERT rows
                          lin_w_ref, lin_b_ref,      # (768, XY) bf16, (1, XY) f32
                          wqkv_ref, bqkv_ref,        # (3, E, E) bf16, (3, 1, E) f32
                          wo_ref, bo_ref,            # (E, E) bf16,   (1, E) f32
                          w1_ref, b1_ref,            # (XY, 768) bf16,(1, 768) f32
                          w2_ref, b2_ref,            # (768, 128) bf16,(1, 128) f32
                          o_ref,                     # (1, 1, 128) f32
                          *, x_dim, y_dim, num_heads):
    del ex_ref                                       # only used by the index_maps
    L, E, H = x_dim, y_dim, num_heads
    Dh = E // H

    # ---- shared self.linear, run once on the [x_emb; y_emb] pair ------------
    emb2 = jnp.concatenate([xemb_ref[0], yemb_ref[0]], axis=0)            # (2, 768) bf16
    xy = jnp.dot(emb2, lin_w_ref[...], preferred_element_type=jnp.float32)
    xy = (xy + lin_b_ref[...]).astype(jnp.bfloat16)                       # (2, XY)

    # flat (1, L*E) rows -> (L, E) matrices: static lane slices + sublane concat
    # (avoids relying on in-kernel reshape lowering for sub-tile shapes)
    x_mat = jnp.concatenate([xy[0:1, l * E:(l + 1) * E] for l in range(L)], axis=0)
    y_mat = jnp.concatenate([xy[1:2, l * E:(l + 1) * E] for l in range(L)], axis=0)

    # ---- multi-head attention: Q from x, K/V from y --------------------------
    # 1/sqrt(Dh) is folded into Wq / bq at prepare_params() time.
    q = jnp.dot(x_mat, wqkv_ref[0], preferred_element_type=jnp.float32) + bqkv_ref[0]
    k = jnp.dot(y_mat, wqkv_ref[1], preferred_element_type=jnp.float32) + bqkv_ref[1]
    v = jnp.dot(y_mat, wqkv_ref[2], preferred_element_type=jnp.float32) + bqkv_ref[2]
    q = q.astype(jnp.bfloat16)                       # bf16 MXU operands, f32 accumulate
    k = k.astype(jnp.bfloat16)
    v = v.astype(jnp.bfloat16)

    heads = []
    for h in range(H):                               # static unroll over heads
        sl = slice(h * Dh, (h + 1) * Dh)
        s = lax.dot_general(q[:, sl], k[:, sl], (((1,), (1,)), ((), ())),
                            preferred_element_type=jnp.float32)          # (L, L) f32
        m = jnp.max(s, axis=-1, keepdims=True)
        p = jnp.exp(s - m)                                               # f32 softmax
        denom = jnp.sum(p, axis=-1, keepdims=True)
        oh = lax.dot_general(p.astype(jnp.bfloat16), v[:, sl],
                             (((1,), (0,)), ((), ())),
                             preferred_element_type=jnp.float32)         # (L, Dh) f32
        heads.append((oh / denom).astype(jnp.bfloat16))                  # exact divide
    # heads merged ONCE -> single (L, E) @ (E, E) out-projection
    o_cat = jnp.concatenate(heads, axis=1)                               # (L, E) bf16
    attn = jnp.dot(o_cat, wo_ref[...], preferred_element_type=jnp.float32) + bo_ref[...]
    attn = attn.astype(jnp.bfloat16)                                     # (L, E)

    # (L, E) -> flat (1, L*E): static sublane slices + lane concat
    a_flat = jnp.concatenate([attn[l:l + 1, :] for l in range(L)], axis=1)  # (1, XY)

    # ---- classifier MLP (Linear -> ReLU -> Linear), 128-lane padded logits ---
    h1 = jnp.dot(a_flat, w1_ref[...], preferred_element_type=jnp.float32) + b1_ref[...]
    h1 = jnp.maximum(h1, 0.0).astype(jnp.bfloat16)                        # (1, 768)
    logits = (jnp.dot(h1, w2_ref[...], preferred_element_type=jnp.float32)
              + b2_ref[...])                                              # (1, 128) f32
    o_ref[0] = logits


def fused_forward(prep, ex, *, x_dim, y_dim, num_heads):
    """Whole AttnBertNet forward in one pallas_call. ex: (B, 2) int32 -> (B, 2) f32."""
    B = ex.shape[0]
    L, E, H = x_dim, y_dim, num_heads
    XY = L * E

    flops_per_ex = (2 * 2 * DIM * XY                      # shared linear (x and y rows)
                    + 3 * 2 * L * E * E                   # QKV projections
                    + H * 4 * L * L * (E // H)            # scores + P@V
                    + 2 * L * E * E                       # out projection
                    + 2 * XY * DIM + 2 * DIM * HEAD_PAD)  # classifier MLP
    weight_bytes = (2 * (DIM * XY + 3 * E * E + E * E + XY * DIM + DIM * HEAD_PAD)
                    + 4 * (XY + 3 * E + E + DIM + HEAD_PAD))
    per_ex_bytes = 2 * 2 * DIM + 4 * HEAD_PAD             # 2 bf16 emb rows + f32 logits
    cost = pl.CostEstimate(flops=B * flops_per_ex,
                           transcendentals=B * H * L * L,
                           bytes_accessed=weight_bytes + B * per_ex_bytes)

    kernel = functools.partial(_fused_forward_kernel,
                               x_dim=L, y_dim=E, num_heads=H)
    const2 = lambda b, ex_ref: (0, 0)
    const3 = lambda b, ex_ref: (0, 0, 0)

    out = pl.pallas_call(
        kernel,
        out_shape=jax.ShapeDtypeStruct((B, 1, HEAD_PAD), jnp.float32),
        grid_spec=pltpu.PrefetchScalarGridSpec(
            num_scalar_prefetch=1,                        # ex -> SMEM, drives the gathers
            grid=(B,),                                    # 2 parallel steps -> both v7x TCs
            in_specs=[
                # data-dependent BERT-row gather (in-kernel embedding lookup)
                pl.BlockSpec((1, 1, DIM), lambda b, ex_ref: (ex_ref[b, 0], 0, 0)),
                pl.BlockSpec((1, 1, DIM), lambda b, ex_ref: (ex_ref[b, 1], 0, 0)),
                # weights / biases: constant index_map -> one DMA, VMEM-resident
                pl.BlockSpec((DIM, XY), const2),
                pl.BlockSpec((1, XY), const2),
                pl.BlockSpec((3, E, E), const3),
                pl.BlockSpec((3, 1, E), const3),
                pl.BlockSpec((E, E), const2),
                pl.BlockSpec((1, E), const2),
                pl.BlockSpec((XY, DIM), const2),
                pl.BlockSpec((1, DIM), const2),
                pl.BlockSpec((DIM, HEAD_PAD), const2),
                pl.BlockSpec((1, HEAD_PAD), const2),
            ],
            out_specs=pl.BlockSpec((1, 1, HEAD_PAD), lambda b, ex_ref: (b, 0, 0)),
        ),
        compiler_params=pltpu.CompilerParams(
            dimension_semantics=("parallel",),
            vmem_limit_bytes=32 * 1024 * 1024,            # explicit headroom (v7x: 64 MiB VMEM)
        ),
        cost_estimate=cost,
    )(ex,
      prep["bert_table"], prep["bert_table"],
      prep["lin_w"], prep["lin_b"],
      prep["attn_wqkv"], prep["attn_bqkv"],
      prep["attn_wo"], prep["attn_bo"],
      prep["net_w1"], prep["net_b1"],
      prep["net_w2"], prep["net_b2"])
    return out[:, 0, :2]                                  # strip the 128-lane padding


# ----------------------------------------------------------------------------
# Parameter construction (deterministic, synthetic; PyTorch layouts, f32)
# ----------------------------------------------------------------------------
def init_params(key, x_dim, y_dim, num_heads, vocab):
    E = y_dim
    XY = x_dim * y_dim
    keys = jax.random.split(key, 10)

    def w(k, shape, fan_in):
        return jax.random.normal(k, shape, jnp.float32) / jnp.sqrt(float(fan_in))

    return {
        # stand-in for load.Bert(): a table of 768-d sentence embeddings
        "bert_table": jax.random.normal(keys[0], (vocab, DIM), jnp.float32),
        # nn.Linear(768, x_dim*y_dim): stored as (in, out)
        "lin_w": w(keys[1], (DIM, XY), DIM),
        "lin_b": w(keys[2], (XY,), DIM),
        # nn.MultiheadAttention(y_dim, num_heads)
        "in_proj_w": w(keys[3], (3 * E, E), E),   # PyTorch layout (3E, E)
        "in_proj_b": w(keys[4], (3 * E,), E),
        "out_proj_w": w(keys[5], (E, E), E),      # PyTorch layout (out, in)
        "out_proj_b": w(keys[6], (E,), E),
        # nn.Sequential(Linear(XY, 768), ReLU, Linear(768, 2)): stored (in, out)
        "net_w1": w(keys[7], (XY, DIM), XY),
        "net_b1": w(keys[8], (DIM,), XY),
        "net_w2": w(keys[9], (DIM, 2), DIM),
        "net_b2": jnp.zeros((2,), jnp.float32),
    }


def prepare_params(p, *, x_dim, y_dim, num_heads):
    """One-time layout prep: pre-transpose / stack / scale-fold weights, cast
    matmul operands to bf16 (biases stay f32), pad the 2-wide head to 128."""
    E = y_dim
    Dh = E // num_heads
    XY = x_dim * y_dim
    vocab = p["bert_table"].shape[0]
    scale = 1.0 / math.sqrt(Dh)

    wq, wk, wv = jnp.split(p["in_proj_w"], 3, axis=0)     # each (E, E), (out, in)
    bq, bk, bv = jnp.split(p["in_proj_b"], 3)
    wqkv = jnp.stack([wq.T * scale, wk.T, wv.T], axis=0)          # (3, E, E)
    bqkv = jnp.stack([bq * scale, bk, bv], axis=0).reshape(3, 1, E)

    w2_pad = jnp.zeros((DIM, HEAD_PAD), jnp.float32).at[:, :2].set(p["net_w2"])
    b2_pad = jnp.zeros((1, HEAD_PAD), jnp.float32).at[0, :2].set(p["net_b2"])

    return {
        # (vocab, 1, 768): last two block dims match full dims for the row gather
        "bert_table": p["bert_table"].astype(jnp.bfloat16).reshape(vocab, 1, DIM),
        "lin_w": p["lin_w"].astype(jnp.bfloat16),                       # (768, XY)
        "lin_b": p["lin_b"].reshape(1, XY),                             # f32
        "attn_wqkv": wqkv.astype(jnp.bfloat16),                         # scale folded
        "attn_bqkv": bqkv,                                              # f32
        "attn_wo": p["out_proj_w"].T.astype(jnp.bfloat16),              # (E, E) pre-T
        "attn_bo": p["out_proj_b"].reshape(1, E),                       # f32
        "net_w1": p["net_w1"].astype(jnp.bfloat16),                     # (XY, 768)
        "net_b1": p["net_b1"].reshape(1, DIM),                          # f32
        "net_w2": w2_pad.astype(jnp.bfloat16),                          # (768, 128)
        "net_b2": b2_pad,                                               # (1, 128) f32
    }


# ----------------------------------------------------------------------------
# Forward pass (mirrors AttnBertNet.forward — one fused pallas_call)
# ----------------------------------------------------------------------------
@functools.partial(jax.jit, static_argnames=("x_dim", "y_dim", "num_heads"))
def attn_bert_net_forward(prep, ex, *, x_dim, y_dim, num_heads):
    return fused_forward(prep, ex, x_dim=x_dim, y_dim=y_dim, num_heads=num_heads)


# ----------------------------------------------------------------------------
# Pure-jnp f32 reference (for numerical sanity check)
# ----------------------------------------------------------------------------
def reference_forward(params, ex, *, x_dim, y_dim, num_heads):
    B = ex.shape[0]
    E, H = y_dim, num_heads
    Dh, L = E // H, x_dim
    table = params["bert_table"]
    x_emb = jnp.take(table, ex[:, 0], axis=0)
    y_emb = jnp.take(table, ex[:, 1], axis=0)
    x = (x_emb @ params["lin_w"] + params["lin_b"]).reshape(B, L, E).transpose(1, 0, 2)
    y = (y_emb @ params["lin_w"] + params["lin_b"]).reshape(B, L, E).transpose(1, 0, 2)
    wq, wk, wv = jnp.split(params["in_proj_w"], 3, axis=0)
    bq, bk, bv = jnp.split(params["in_proj_b"], 3)
    q = (x.reshape(L * B, E) @ wq.T + bq).reshape(L, B, H, Dh).transpose(1, 2, 0, 3)
    k = (y.reshape(L * B, E) @ wk.T + bk).reshape(L, B, H, Dh).transpose(1, 2, 0, 3)
    v = (y.reshape(L * B, E) @ wv.T + bv).reshape(L, B, H, Dh).transpose(1, 2, 0, 3)
    s = jnp.einsum("bhld,bhsd->bhls", q, k) / jnp.sqrt(float(Dh))
    p = jax.nn.softmax(s, axis=-1)
    o = jnp.einsum("bhls,bhsd->bhld", p, v)  # (B, H, L, Dh)
    o = o.transpose(2, 0, 1, 3).reshape(L * B, E)
    o = o @ params["out_proj_w"].T + params["out_proj_b"]
    a = o.reshape(L, B, E).transpose(1, 0, 2).reshape(B, L * E)
    h = jnp.maximum(a @ params["net_w1"] + params["net_b1"], 0.0)
    return h @ params["net_w2"] + params["net_b2"]


if __name__ == "__main__":
    # Small shapes consistent with the module: 768-d BERT embeddings,
    # x_dim (sequence length after reshape) = 8, y_dim (attention embed) = 32,
    # num_heads = 4 (head_dim = 8), batch of 2 example pairs, vocab of 16.
    x_dim, y_dim, num_heads = 8, 32, 4
    batch, vocab = 2, 16

    key = jax.random.PRNGKey(0)
    pkey, ekey = jax.random.split(key)
    params = init_params(pkey, x_dim, y_dim, num_heads, vocab)
    prep = prepare_params(params, x_dim=x_dim, y_dim=y_dim, num_heads=num_heads)
    # ex: integer index pairs into the synthetic BERT embedding table
    ex = jax.random.randint(ekey, (batch, 2), 0, vocab, dtype=jnp.int32)

    out = attn_bert_net_forward(
        prep, ex, x_dim=x_dim, y_dim=y_dim, num_heads=num_heads
    )
    out = jax.block_until_ready(out)
    assert out.shape == (batch, 2), out.shape

    ref = reference_forward(params, ex, x_dim=x_dim, y_dim=y_dim, num_heads=num_heads)
    # bf16 matmul operands with f32 accumulation; softmax normalization is exact
    assert jnp.allclose(out, ref, atol=5e-2, rtol=5e-2), (out, ref)

    print("KERNEL_OK")
</pallas_src>

<mosaic_0001>
module attributes {stable_mosaic.version = 11 : i64} {
  func.func @_fused_forward_kernel(%arg0: i32, %arg1: memref<2x2xi32, #tpu.memory_space<smem>>, %arg2: memref<1x1x768xbf16, #tpu.memory_space<vmem>>, %arg3: memref<1x1x768xbf16, #tpu.memory_space<vmem>>, %arg4: memref<768x256xbf16, #tpu.memory_space<vmem>>, %arg5: memref<1x256xf32, #tpu.memory_space<vmem>>, %arg6: memref<3x32x32xbf16, #tpu.memory_space<vmem>>, %arg7: memref<3x1x32xf32, #tpu.memory_space<vmem>>, %arg8: memref<32x32xbf16, #tpu.memory_space<vmem>>, %arg9: memref<1x32xf32, #tpu.memory_space<vmem>>, %arg10: memref<256x768xbf16, #tpu.memory_space<vmem>>, %arg11: memref<1x768xf32, #tpu.memory_space<vmem>>, %arg12: memref<768x128xbf16, #tpu.memory_space<vmem>>, %arg13: memref<1x128xf32, #tpu.memory_space<vmem>>, %arg14: memref<1x1x128xf32, #tpu.memory_space<vmem>>) attributes {dimension_semantics = [#tpu.dimension_semantics<parallel>], iteration_bounds = array<i64: 2>, scalar_prefetch = 1 : i64, scratch_operands = 0 : i64, tpu.core_type = #tpu.core_type<tc>, window_params = [{transform_indices = @transform_0, window_bounds = array<i64: 1, 1, 768>}, {transform_indices = @transform_1, window_bounds = array<i64: 1, 1, 768>}, {pipeline_mode = #tpu.pipeline_mode<synchronous>, transform_indices = @transform_2, window_bounds = array<i64: 768, 256>}, {pipeline_mode = #tpu.pipeline_mode<synchronous>, transform_indices = @transform_3, window_bounds = array<i64: 1, 256>}, {pipeline_mode = #tpu.pipeline_mode<synchronous>, transform_indices = @transform_4, window_bounds = array<i64: 3, 32, 32>}, {pipeline_mode = #tpu.pipeline_mode<synchronous>, transform_indices = @transform_5, window_bounds = array<i64: 3, 1, 32>}, {pipeline_mode = #tpu.pipeline_mode<synchronous>, transform_indices = @transform_6, window_bounds = array<i64: 32, 32>}, {pipeline_mode = #tpu.pipeline_mode<synchronous>, transform_indices = @transform_7, window_bounds = array<i64: 1, 32>}, {pipeline_mode = #tpu.pipeline_mode<synchronous>, transform_indices = @transform_8, window_bounds = array<i64: 256, 768>}, {pipeline_mode = #tpu.pipeline_mode<synchronous>, transform_indices = @transform_9, window_bounds = array<i64: 1, 768>}, {pipeline_mode = #tpu.pipeline_mode<synchronous>, transform_indices = @transform_10, window_bounds = array<i64: 768, 128>}, {pipeline_mode = #tpu.pipeline_mode<synchronous>, transform_indices = @transform_11, window_bounds = array<i64: 1, 128>}, {transform_indices = @transform_12, window_bounds = array<i64: 1, 1, 128>}]} {
    %c0 = arith.constant 0 : index
    %c0_0 = arith.constant 0 : index
    %c0_1 = arith.constant 0 : index
    %0 = vector.load %arg2[%c0, %c0_0, %c0_1] : memref<1x1x768xbf16, #tpu.memory_space<vmem>>, vector<1x1x768xbf16>
    %1 = vector.shape_cast %0 : vector<1x1x768xbf16> to vector<1x768xbf16>
    %c0_2 = arith.constant 0 : index
    %c0_3 = arith.constant 0 : index
    %c0_4 = arith.constant 0 : index
    %2 = vector.load %arg3[%c0_2, %c0_3, %c0_4] : memref<1x1x768xbf16, #tpu.memory_space<vmem>>, vector<1x1x768xbf16>
    %3 = vector.shape_cast %2 : vector<1x1x768xbf16> to vector<1x768xbf16>
    %4 = tpu.concatenate %1, %3 in 0 : vector<1x768xbf16>, vector<1x768xbf16> -> vector<2x768xbf16>
    %c0_5 = arith.constant 0 : index
    %c0_6 = arith.constant 0 : index
    %5 = vector.load %arg4[%c0_5, %c0_6] : memref<768x256xbf16, #tpu.memory_space<vmem>>, vector<768x256xbf16>
    %cst = arith.constant dense<0.000000e+00> : vector<2x256xf32>
    %6 = tpu.matmul %4, %5, %cst {dimension_numbers = #tpu.dot_dimension_numbers<[1], [0], [0], [1], [0, 0, 1, 1], [], []>} : vector<2x768xbf16>, vector<768x256xbf16>, vector<2x256xf32> -> vector<2x256xf32>
    %c0_7 = arith.constant 0 : index
    %c0_8 = arith.constant 0 : index
    %7 = vector.load %arg5[%c0_7, %c0_8] : memref<1x256xf32, #tpu.memory_space<vmem>>, vector<1x256xf32>
    %8 = vector.broadcast %7 : vector<1x256xf32> to vector<2x256xf32>
    %9 = arith.addf %6, %8 : vector<2x256xf32>
    %10 = arith.truncf %9 : vector<2x256xf32> to vector<2x256xbf16>
    %11 = vector.extract_strided_slice %10 {offsets = [0, 0], sizes = [1, 32], strides = [1, 1]} : vector<2x256xbf16> to vector<1x32xbf16>
    %12 = vector.extract_strided_slice %10 {offsets = [0, 32], sizes = [1, 32], strides = [1, 1]} : vector<2x256xbf16> to vector<1x32xbf16>
    %13 = vector.extract_strided_slice %10 {offsets = [0, 64], sizes = [1, 32], strides = [1, 1]} : vector<2x256xbf16> to vector<1x32xbf16>
    %14 = vector.extract_strided_slice %10 {offsets = [0, 96], sizes = [1, 32], strides = [1, 1]} : vector<2x256xbf16> to vector<1x32xbf16>
    %15 = vector.extract_strided_slice %10 {offsets = [0, 128], sizes = [1, 32], strides = [1, 1]} : vector<2x256xbf16> to vector<1x32xbf16>
    %16 = vector.extract_strided_slice %10 {offsets = [0, 160], sizes = [1, 32], strides = [1, 1]} : vector<2x256xbf16> to vector<1x32xbf16>
    %17 = vector.extract_strided_slice %10 {offsets = [0, 192], sizes = [1, 32], strides = [1, 1]} : vector<2x256xbf16> to vector<1x32xbf16>
    %18 = vector.extract_strided_slice %10 {offsets = [0, 224], sizes = [1, 32], strides = [1, 1]} : vector<2x256xbf16> to vector<1x32xbf16>
    %19 = tpu.concatenate %11, %12, %13, %14, %15, %16, %17, %18 in 0 : vector<1x32xbf16>, vector<1x32xbf16>, vector<1x32xbf16>, vector<1x32xbf16>, vector<1x32xbf16>, vector<1x32xbf16>, vector<1x32xbf16>, vector<1x32xbf16> -> vector<8x32xbf16>
    %20 = vector.extract_strided_slice %10 {offsets = [1, 0], sizes = [1, 32], strides = [1, 1]} : vector<2x256xbf16> to vector<1x32xbf16>
    %21 = vector.extract_strided_slice %10 {offsets = [1, 32], sizes = [1, 32], strides = [1, 1]} : vector<2x256xbf16> to vector<1x32xbf16>
    %22 = vector.extract_strided_slice %10 {offsets = [1, 64], sizes = [1, 32], strides = [1, 1]} : vector<2x256xbf16> to vector<1x32xbf16>
    %23 = vector.extract_strided_slice %10 {offsets = [1, 96], sizes = [1, 32], strides = [1, 1]} : vector<2x256xbf16> to vector<1x32xbf16>
    %24 = vector.extract_strided_slice %10 {offsets = [1, 128], sizes = [1, 32], strides = [1, 1]} : vector<2x256xbf16> to vector<1x32xbf16>
    %25 = vector.extract_strided_slice %10 {offsets = [1, 160], sizes = [1, 32], strides = [1, 1]} : vector<2x256xbf16> to vector<1x32xbf16>
    %26 = vector.extract_strided_slice %10 {offsets = [1, 192], sizes = [1, 32], strides = [1, 1]} : vector<2x256xbf16> to vector<1x32xbf16>
    %27 = vector.extract_strided_slice %10 {offsets = [1, 224], sizes = [1, 32], strides = [1, 1]} : vector<2x256xbf16> to vector<1x32xbf16>
    %28 = tpu.concatenate %20, %21, %22, %23, %24, %25, %26, %27 in 0 : vector<1x32xbf16>, vector<1x32xbf16>, vector<1x32xbf16>, vector<1x32xbf16>, vector<1x32xbf16>, vector<1x32xbf16>, vector<1x32xbf16>, vector<1x32xbf16> -> vector<8x32xbf16>
    %c0_9 = arith.constant 0 : index
    %c0_10 = arith.constant 0 : index
    %c0_11 = arith.constant 0 : index
    %29 = vector.load %arg6[%c0_9, %c0_10, %c0_11] : memref<3x32x32xbf16, #tpu.memory_space<vmem>>, vector<1x32x32xbf16>
    %30 = vector.shape_cast %29 : vector<1x32x32xbf16> to vector<32x32xbf16>
    %cst_12 = arith.constant dense<0.000000e+00> : vector<8x32xf32>
    %31 = tpu.matmul %19, %30, %cst_12 {dimension_numbers = #tpu.dot_dimension_numbers<[1], [0], [0], [1], [0, 0, 1, 1], [], []>} : vector<8x32xbf16>, vector<32x32xbf16>, vector<8x32xf32> -> vector<8x32xf32>
    %c0_13 = arith.constant 0 : index
    %c0_14 = arith.constant 0 : index
    %c0_15 = arith.constant 0 : index
    %32 = vector.load %arg7[%c0_13, %c0_14, %c0_15] : memref<3x1x32xf32, #tpu.memory_space<vmem>>, vector<1x1x32xf32>
    %33 = vector.shape_cast %32 : vector<1x1x32xf32> to vector<1x32xf32>
    %34 = vector.broadcast %33 : vector<1x32xf32> to vector<8x32xf32>
    %35 = arith.addf %31, %34 : vector<8x32xf32>
    %c1 = arith.constant 1 : index
    %c0_16 = arith.constant 0 : index
    %c0_17 = arith.constant 0 : index
    %36 = vector.load %arg6[%c1, %c0_16, %c0_17] : memref<3x32x32xbf16, #tpu.memory_space<vmem>>, vector<1x32x32xbf16>
    %37 = vector.shape_cast %36 : vector<1x32x32xbf16> to vector<32x32xbf16>
    %cst_18 = arith.constant dense<0.000000e+00> : vector<8x32xf32>
    %38 = tpu.matmul %28, %37, %cst_18 {dimension_numbers = #tpu.dot_dimension_numbers<[1], [0], [0], [1], [0, 0, 1, 1], [], []>} : vector<8x32xbf16>, vector<32x32xbf16>, vector<8x32xf32> -> vector<8x32xf32>
    %c1_19 = arith.constant 1 : index
    %c0_20 = arith.constant 0 : index
    %c0_21 = arith.constant 0 : index
    %39 = vector.load %arg7[%c1_19, %c0_20, %c0_21] : memref<3x1x32xf32, #tpu.memory_space<vmem>>, vector<1x1x32xf32>
    %40 = vector.shape_cast %39 : vector<1x1x32xf32> to vector<1x32xf32>
    %41 = vector.broadcast %40 : vector<1x32xf32> to vector<8x32xf32>
    %42 = arith.addf %38, %41 : vector<8x32xf32>
    %c2 = arith.constant 2 : index
    %c0_22 = arith.constant 0 : index
    %c0_23 = arith.constant 0 : index
    %43 = vector.load %arg6[%c2, %c0_22, %c0_23] : memref<3x32x32xbf16, #tpu.memory_space<vmem>>, vector<1x32x32xbf16>
    %44 = vector.shape_cast %43 : vector<1x32x32xbf16> to vector<32x32xbf16>
    %cst_24 = arith.constant dense<0.000000e+00> : vector<8x32xf32>
    %45 = tpu.matmul %28, %44, %cst_24 {dimension_numbers = #tpu.dot_dimension_numbers<[1], [0], [0], [1], [0, 0, 1, 1], [], []>} : vector<8x32xbf16>, vector<32x32xbf16>, vector<8x32xf32> -> vector<8x32xf32>
    %c2_25 = arith.constant 2 : index
    %c0_26 = arith.constant 0 : index
    %c0_27 = arith.constant 0 : index
    %46 = vector.load %arg7[%c2_25, %c0_26, %c0_27] : memref<3x1x32xf32, #tpu.memory_space<vmem>>, vector<1x1x32xf32>
    %47 = vector.shape_cast %46 : vector<1x1x32xf32> to vector<1x32xf32>
    %48 = vector.broadcast %47 : vector<1x32xf32> to vector<8x32xf32>
    %49 = arith.addf %45, %48 : vector<8x32xf32>
    %50 = arith.truncf %35 : vector<8x32xf32> to vector<8x32xbf16>
    %51 = arith.truncf %42 : vector<8x32xf32> to vector<8x32xbf16>
    %52 = arith.truncf %49 : vector<8x32xf32> to vector<8x32xbf16>
    %53 = vector.extract_strided_slice %50 {offsets = [0, 0], sizes = [8, 8], strides = [1, 1]} : vector<8x32xbf16> to vector<8x8xbf16>
    %54 = vector.extract_strided_slice %51 {offsets = [0, 0], sizes = [8, 8], strides = [1, 1]} : vector<8x32xbf16> to vector<8x8xbf16>
    %cst_28 = arith.constant dense<0.000000e+00> : vector<8x8xf32>
    %55 = tpu.matmul %53, %54, %cst_28 {dimension_numbers = #tpu.dot_dimension_numbers<[1], [1], [0], [0], [0, 0, 1, 0], [], []>} : vector<8x8xbf16>, vector<8x8xbf16>, vector<8x8xf32> -> vector<8x8xf32>
    %cst_29 = arith.constant dense<0xFF800000> : vector<8xf32>
    %56 = vector.multi_reduction <maximumf>, %55, %cst_29 [1] : vector<8x8xf32> to vector<8xf32>
    %57 = vector.shape_cast %56 : vector<8xf32> to vector<8x1xf32>
    %58 = vector.broadcast %57 : vector<8x1xf32> to vector<8x8xf32>
    %59 = arith.subf %55, %58 : vector<8x8xf32>
    %60 = math.exp %59 : vector<8x8xf32>
    %cst_30 = arith.constant dense<0.000000e+00> : vector<8xf32>
    %61 = vector.multi_reduction <add>, %60, %cst_30 [1] : vector<8x8xf32> to vector<8xf32>
    %62 = vector.shape_cast %61 : vector<8xf32> to vector<8x1xf32>
    %63 = arith.truncf %60 : vector<8x8xf32> to vector<8x8xbf16>
    %64 = vector.extract_strided_slice %52 {offsets = [0, 0], sizes = [8, 8], strides = [1, 1]} : vector<8x32xbf16> to vector<8x8xbf16>
    %cst_31 = arith.constant dense<0.000000e+00> : vector<8x8xf32>
    %65 = tpu.matmul %63, %64, %cst_31 {dimension_numbers = #tpu.dot_dimension_numbers<[1], [0], [0], [1], [0, 0, 1, 1], [], []>} : vector<8x8xbf16>, vector<8x8xbf16>, vector<8x8xf32> -> vector<8x8xf32>
    %66 = vector.broadcast %62 : vector<8x1xf32> to vector<8x8xf32>
    %67 = arith.divf %65, %66 : vector<8x8xf32>
    %68 = arith.truncf %67 : vector<8x8xf32> to vector<8x8xbf16>
    %69 = vector.extract_strided_slice %50 {offsets = [0, 8], sizes = [8, 8], strides = [1, 1]} : vector<8x32xbf16> to vector<8x8xbf16>
    %70 = vector.extract_strided_slice %51 {offsets = [0, 8], sizes = [8, 8], strides = [1, 1]} : vector<8x32xbf16> to vector<8x8xbf16>
    %cst_32 = arith.constant dense<0.000000e+00> : vector<8x8xf32>
    %71 = tpu.matmul %69, %70, %cst_32 {dimension_numbers = #tpu.dot_dimension_numbers<[1], [1], [0], [0], [0, 0, 1, 0], [], []>} : vector<8x8xbf16>, vector<8x8xbf16>, vector<8x8xf32> -> vector<8x8xf32>
    %cst_33 = arith.constant dense<0xFF800000> : vector<8xf32>
    %72 = vector.multi_reduction <maximumf>, %71, %cst_33 [1] : vector<8x8xf32> to vector<8xf32>
    %73 = vector.shape_cast %72 : vector<8xf32> to vector<8x1xf32>
    %74 = vector.broadcast %73 : vector<8x1xf32> to vector<8x8xf32>
    %75 = arith.subf %71, %74 : vector<8x8xf32>
    %76 = math.exp %75 : vector<8x8xf32>
    %cst_34 = arith.constant dense<0.000000e+00> : vector<8xf32>
    %77 = vector.multi_reduction <add>, %76, %cst_34 [1] : vector<8x8xf32> to vector<8xf32>
    %78 = vector.shape_cast %77 : vector<8xf32> to vector<8x1xf32>
    %79 = arith.truncf %76 : vector<8x8xf32> to vector<8x8xbf16>
    %80 = vector.extract_strided_slice %52 {offsets = [0, 8], sizes = [8, 8], strides = [1, 1]} : vector<8x32xbf16> to vector<8x8xbf16>
    %cst_35 = arith.constant dense<0.000000e+00> : vector<8x8xf32>
    %81 = tpu.matmul %79, %80, %cst_35 {dimension_numbers = #tpu.dot_dimension_numbers<[1], [0], [0], [1], [0, 0, 1, 1], [], []>} : vector<8x8xbf16>, vector<8x8xbf16>, vector<8x8xf32> -> vector<8x8xf32>
    %82 = vector.broadcast %78 : vector<8x1xf32> to vector<8x8xf32>
    %83 = arith.divf %81, %82 : vector<8x8xf32>
    %84 = arith.truncf %83 : vector<8x8xf32> to vector<8x8xbf16>
    %85 = vector.extract_strided_slice %50 {offsets = [0, 16], sizes = [8, 8], strides = [1, 1]} : vector<8x32xbf16> to vector<8x8xbf16>
    %86 = vector.extract_strided_slice %51 {offsets = [0, 16], sizes = [8, 8], strides = [1, 1]} : vector<8x32xbf16> to vector<8x8xbf16>
    %cst_36 = arith.constant dense<0.000000e+00> : vector<8x8xf32>
    %87 = tpu.matmul %85, %86, %cst_36 {dimension_numbers = #tpu.dot_dimension_numbers<[1], [1], [0], [0], [0, 0, 1, 0], [], []>} : vector<8x8xbf16>, vector<8x8xbf16>, vector<8x8xf32> -> vector<8x8xf32>
    %cst_37 = arith.constant dense<0xFF800000> : vector<8xf32>
    %88 = vector.multi_reduction <maximumf>, %87, %cst_37 [1] : vector<8x8xf32> to vector<8xf32>
    %89 = vector.shape_cast %88 : vector<8xf32> to vector<8x1xf32>
    %90 = vector.broadcast %89 : vector<8x1xf32> to vector<8x8xf32>
    %91 = arith.subf %87, %90 : vector<8x8xf32>
    %92 = math.exp %91 : vector<8x8xf32>
    %cst_38 = arith.constant dense<0.000000e+00> : vector<8xf32>
    %93 = vector.multi_reduction <add>, %92, %cst_38 [1] : vector<8x8xf32> to vector<8xf32>
    %94 = vector.shape_cast %93 : vector<8xf32> to vector<8x1xf32>
    %95 = arith.truncf %92 : vector<8x8xf32> to vector<8x8xbf16>
    %96 = vector.extract_strided_slice %52 {offsets = [0, 16], sizes = [8, 8], strides = [1, 1]} : vector<8x32xbf16> to vector<8x8xbf16>
    %cst_39 = arith.constant dense<0.000000e+00> : vector<8x8xf32>
    %97 = tpu.matmul %95, %96, %cst_39 {dimension_numbers = #tpu.dot_dimension_numbers<[1], [0], [0], [1], [0, 0, 1, 1], [], []>} : vector<8x8xbf16>, vector<8x8xbf16>, vector<8x8xf32> -> vector<8x8xf32>
    %98 = vector.broadcast %94 : vector<8x1xf32> to vector<8x8xf32>
    %99 = arith.divf %97, %98 : vector<8x8xf32>
    %100 = arith.truncf %99 : vector<8x8xf32> to vector<8x8xbf16>
    %101 = vector.extract_strided_slice %50 {offsets = [0, 24], sizes = [8, 8], strides = [1, 1]} : vector<8x32xbf16> to vector<8x8xbf16>
    %102 = vector.extract_strided_slice %51 {offsets = [0, 24], sizes = [8, 8], strides = [1, 1]} : vector<8x32xbf16> to vector<8x8xbf16>
    %cst_40 = arith.constant dense<0.000000e+00> : vector<8x8xf32>
    %103 = tpu.matmul %101, %102, %cst_40 {dimension_numbers = #tpu.dot_dimension_numbers<[1], [1], [0], [0], [0, 0, 1, 0], [], []>} : vector<8x8xbf16>, vector<8x8xbf16>, vector<8x8xf32> -> vector<8x8xf32>
    %cst_41 = arith.constant dense<0xFF800000> : vector<8xf32>
    %104 = vector.multi_reduction <maximumf>, %103, %cst_41 [1] : vector<8x8xf32> to vector<8xf32>
    %105 = vector.shape_cast %104 : vector<8xf32> to vector<8x1xf32>
    %106 = vector.broadcast %105 : vector<8x1xf32> to vector<8x8xf32>
    %107 = arith.subf %103, %106 : vector<8x8xf32>
    %108 = math.exp %107 : vector<8x8xf32>
    %cst_42 = arith.constant dense<0.000000e+00> : vector<8xf32>
    %109 = vector.multi_reduction <add>, %108, %cst_42 [1] : vector<8x8xf32> to vector<8xf32>
    %110 = vector.shape_cast %109 : vector<8xf32> to vector<8x1xf32>
    %111 = arith.truncf %108 : vector<8x8xf32> to vector<8x8xbf16>
    %112 = vector.extract_strided_slice %52 {offsets = [0, 24], sizes = [8, 8], strides = [1, 1]} : vector<8x32xbf16> to vector<8x8xbf16>
    %cst_43 = arith.constant dense<0.000000e+00> : vector<8x8xf32>
    %113 = tpu.matmul %111, %112, %cst_43 {dimension_numbers = #tpu.dot_dimension_numbers<[1], [0], [0], [1], [0, 0, 1, 1], [], []>} : vector<8x8xbf16>, vector<8x8xbf16>, vector<8x8xf32> -> vector<8x8xf32>
    %114 = vector.broadcast %110 : vector<8x1xf32> to vector<8x8xf32>
    %115 = arith.divf %113, %114 : vector<8x8xf32>
    %116 = arith.truncf %115 : vector<8x8xf32> to vector<8x8xbf16>
    %117 = tpu.concatenate %68, %84, %100, %116 in 1 : vector<8x8xbf16>, vector<8x8xbf16>, vector<8x8xbf16>, vector<8x8xbf16> -> vector<8x32xbf16>
    %c0_44 = arith.constant 0 : index
    %c0_45 = arith.constant 0 : index
    %118 = vector.load %arg8[%c0_44, %c0_45] : memref<32x32xbf16, #tpu.memory_space<vmem>>, vector<32x32xbf16>
    %cst_46 = arith.constant dense<0.000000e+00> : vector<8x32xf32>
    %119 = tpu.matmul %117, %118, %cst_46 {dimension_numbers = #tpu.dot_dimension_numbers<[1], [0], [0], [1], [0, 0, 1, 1], [], []>} : vector<8x32xbf16>, vector<32x32xbf16>, vector<8x32xf32> -> vector<8x32xf32>
    %c0_47 = arith.constant 0 : index
    %c0_48 = arith.constant 0 : index
    %120 = vector.load %arg9[%c0_47, %c0_48] : memref<1x32xf32, #tpu.memory_space<vmem>>, vector<1x32xf32>
    %121 = vector.broadcast %120 : vector<1x32xf32> to vector<8x32xf32>
    %122 = arith.addf %119, %121 : vector<8x32xf32>
    %123 = arith.truncf %122 : vector<8x32xf32> to vector<8x32xbf16>
    %124 = vector.extract_strided_slice %123 {offsets = [0, 0], sizes = [1, 32], strides = [1, 1]} : vector<8x32xbf16> to vector<1x32xbf16>
    %125 = vector.extract_strided_slice %123 {offsets = [1, 0], sizes = [1, 32], strides = [1, 1]} : vector<8x32xbf16> to vector<1x32xbf16>
    %126 = vector.extract_strided_slice %123 {offsets = [2, 0], sizes = [1, 32], strides = [1, 1]} : vector<8x32xbf16> to vector<1x32xbf16>
    %127 = vector.extract_strided_slice %123 {offsets = [3, 0], sizes = [1, 32], strides = [1, 1]} : vector<8x32xbf16> to vector<1x32xbf16>
    %128 = vector.extract_strided_slice %123 {offsets = [4, 0], sizes = [1, 32], strides = [1, 1]} : vector<8x32xbf16> to vector<1x32xbf16>
    %129 = vector.extract_strided_slice %123 {offsets = [5, 0], sizes = [1, 32], strides = [1, 1]} : vector<8x32xbf16> to vector<1x32xbf16>
    %130 = vector.extract_strided_slice %123 {offsets = [6, 0], sizes = [1, 32], strides = [1, 1]} : vector<8x32xbf16> to vector<1x32xbf16>
    %131 = vector.extract_strided_slice %123 {offsets = [7, 0], sizes = [1, 32], strides = [1, 1]} : vector<8x32xbf16> to vector<1x32xbf16>
    %132 = tpu.concatenate %124, %125, %126, %127, %128, %129, %130, %131 in 1 : vector<1x32xbf16>, vector<1x32xbf16>, vector<1x32xbf16>, vector<1x32xbf16>, vector<1x32xbf16>, vector<1x32xbf16>, vector<1x32xbf16>, vector<1x32xbf16> -> vector<1x256xbf16>
    %c0_49 = arith.constant 0 : index
    %c0_50 = arith.constant 0 : index
    %133 = vector.load %arg10[%c0_49, %c0_50] : memref<256x768xbf16, #tpu.memory_space<vmem>>, vector<256x768xbf16>
    %cst_51 = arith.constant dense<0.000000e+00> : vector<1x768xf32>
    %134 = tpu.matmul %132, %133, %cst_51 {dimension_numbers = #tpu.dot_dimension_numbers<[1], [0], [0], [1], [0, 0, 1, 1], [], []>} : vector<1x256xbf16>, vector<256x768xbf16>, vector<1x768xf32> -> vector<1x768xf32>
    %c0_52 = arith.constant 0 : index
    %c0_53 = arith.constant 0 : index
    %135 = vector.load %arg11[%c0_52, %c0_53] : memref<1x768xf32, #tpu.memory_space<vmem>>, vector<1x768xf32>
    %136 = arith.addf %134, %135 : vector<1x768xf32>
    %cst_54 = arith.constant 0.000000e+00 : f32
    %137 = vector.broadcast %cst_54 : f32 to vector<1x768xf32>
    %138 = arith.maximumf %136, %137 : vector<1x768xf32>
    %139 = arith.truncf %138 : vector<1x768xf32> to vector<1x768xbf16>
    %c0_55 = arith.constant 0 : index
    %c0_56 = arith.constant 0 : index
    %140 = vector.load %arg12[%c0_55, %c0_56] : memref<768x128xbf16, #tpu.memory_space<vmem>>, vector<768x128xbf16>
    %cst_57 = arith.constant dense<0.000000e+00> : vector<1x128xf32>
    %141 = tpu.matmul %139, %140, %cst_57 {dimension_numbers = #tpu.dot_dimension_numbers<[1], [0], [0], [1], [0, 0, 1, 1], [], []>} : vector<1x768xbf16>, vector<768x128xbf16>, vector<1x128xf32> -> vector<1x128xf32>
    %c0_58 = arith.constant 0 : index
    %c0_59 = arith.constant 0 : index
    %142 = vector.load %arg13[%c0_58, %c0_59] : memref<1x128xf32, #tpu.memory_space<vmem>>, vector<1x128xf32>
    %143 = arith.addf %141, %142 : vector<1x128xf32>
    %c0_60 = arith.constant 0 : index
    %c0_61 = arith.constant 0 : index
    %c0_62 = arith.constant 0 : index
    %144 = vector.load %arg14[%c0_60, %c0_61, %c0_62] : memref<1x1x128xf32, #tpu.memory_space<vmem>>, vector<1x1x128xf32>
    %145 = vector.shape_cast %144 : vector<1x1x128xf32> to vector<1x128xf32>
    %146 = vector.shape_cast %143 : vector<1x128xf32> to vector<1x1x128xf32>
    tpu.vector_store %arg14[%c0_60, %c0_61, %c0_62], %146 {strides = array<i32>} : memref<1x1x128xf32, #tpu.memory_space<vmem>>, vector<1x1x128xf32>,
    return
  }
  func.func @transform_0(%arg0: i32, %arg1: memref<2x2xi32, #tpu.memory_space<smem>>) -> (i32, i32, i32) {
    %0 = arith.index_cast %arg0 : i32 to index
    %c0 = arith.constant 0 : index
    %1 = memref.load %arg1[%0, %c0] : memref<2x2xi32, #tpu.memory_space<smem>>
    %c0_i32 = arith.constant 0 : i32
    %c0_i32_0 = arith.constant 0 : i32
    %c0_i32_1 = arith.constant 0 : i32
    return %1, %c0_i32, %c0_i32_0 : i32, i32, i32
  }
  func.func @transform_1(%arg0: i32, %arg1: memref<2x2xi32, #tpu.memory_space<smem>>) -> (i32, i32, i32) {
    %0 = arith.index_cast %arg0 : i32 to index
    %c1 = arith.constant 1 : index
    %1 = memref.load %arg1[%0, %c1] : memref<2x2xi32, #tpu.memory_space<smem>>
    %c0_i32 = arith.constant 0 : i32
    %c0_i32_0 = arith.constant 0 : i32
    %c0_i32_1 = arith.constant 0 : i32
    return %1, %c0_i32, %c0_i32_0 : i32, i32, i32
  }
  func.func @transform_2(%arg0: i32, %arg1: memref<2x2xi32, #tpu.memory_space<smem>>) -> (i32, i32) {
    %c0_i32 = arith.constant 0 : i32
    %c0_i32_0 = arith.constant 0 : i32
    %c0_i32_1 = arith.constant 0 : i32
    return %c0_i32, %c0_i32_0 : i32, i32
  }
  func.func @transform_3(%arg0: i32, %arg1: memref<2x2xi32, #tpu.memory_space<smem>>) -> (i32, i32) {
    %c0_i32 = arith.constant 0 : i32
    %c0_i32_0 = arith.constant 0 : i32
    %c0_i32_1 = arith.constant 0 : i32
    return %c0_i32, %c0_i32_0 : i32, i32
  }
  func.func @transform_4(%arg0: i32, %arg1: memref<2x2xi32, #tpu.memory_space<smem>>) -> (i32, i32, i32) {
    %c0_i32 = arith.constant 0 : i32
    %c0_i32_0 = arith.constant 0 : i32
    %c0_i32_1 = arith.constant 0 : i32
    %c0_i32_2 = arith.constant 0 : i32
    return %c0_i32, %c0_i32_0, %c0_i32_1 : i32, i32, i32
  }
  func.func @transform_5(%arg0: i32, %arg1: memref<2x2xi32, #tpu.memory_space<smem>>) -> (i32, i32, i32) {
    %c0_i32 = arith.constant 0 : i32
    %c0_i32_0 = arith.constant 0 : i32
    %c0_i32_1 = arith.constant 0 : i32
    %c0_i32_2 = arith.constant 0 : i32
    return %c0_i32, %c0_i32_0, %c0_i32_1 : i32, i32, i32
  }
  func.func @transform_6(%arg0: i32, %arg1: memref<2x2xi32, #tpu.memory_space<smem>>) -> (i32, i32) {
    %c0_i32 = arith.constant 0 : i32
    %c0_i32_0 = arith.constant 0 : i32
    %c0_i32_1 = arith.constant 0 : i32
    return %c0_i32, %c0_i32_0 : i32, i32
  }
  func.func @transform_7(%arg0: i32, %arg1: memref<2x2xi32, #tpu.memory_space<smem>>) -> (i32, i32) {
    %c0_i32 = arith.constant 0 : i32
    %c0_i32_0 = arith.constant 0 : i32
    %c0_i32_1 = arith.constant 0 : i32
    return %c0_i32, %c0_i32_0 : i32, i32
  }
  func.func @transform_8(%arg0: i32, %arg1: memref<2x2xi32, #tpu.memory_space<smem>>) -> (i32, i32) {
    %c0_i32 = arith.constant 0 : i32
    %c0_i32_0 = arith.constant 0 : i32
    %c0_i32_1 = arith.constant 0 : i32
    return %c0_i32, %c0_i32_0 : i32, i32
  }
  func.func @transform_9(%arg0: i32, %arg1: memref<2x2xi32, #tpu.memory_space<smem>>) -> (i32, i32) {
    %c0_i32 = arith.constant 0 : i32
    %c0_i32_0 = arith.constant 0 : i32
    %c0_i32_1 = arith.constant 0 : i32
    return %c0_i32, %c0_i32_0 : i32, i32
  }
  func.func @transform_10(%arg0: i32, %arg1: memref<2x2xi32, #tpu.memory_space<smem>>) -> (i32, i32) {
    %c0_i32 = arith.constant 0 : i32
    %c0_i32_0 = arith.constant 0 : i32
    %c0_i32_1 = arith.constant 0 : i32
    return %c0_i32, %c0_i32_0 : i32, i32
  }
  func.func @transform_11(%arg0: i32, %arg1: memref<2x2xi32, #tpu.memory_space<smem>>) -> (i32, i32) {
    %c0_i32 = arith.constant 0 : i32
    %c0_i32_0 = arith.constant 0 : i32
    %c0_i32_1 = arith.constant 0 : i32
    return %c0_i32, %c0_i32_0 : i32, i32
  }
  func.func @transform_12(%arg0: i32, %arg1: memref<2x2xi32, #tpu.memory_space<smem>>) -> (i32, i32, i32) {
    %c0_i32 = arith.constant 0 : i32
    %c0_i32_0 = arith.constant 0 : i32
    %c0_i32_1 = arith.constant 0 : i32
    return %arg0, %c0_i32, %c0_i32_0 : i32, i32, i32
  }
}

</mosaic_0001>

<bundles_post_ra>
// kernel: attn_bert_net_forward.1
= control target key start
LH: loop header
LB: loop body
LE: loop exit
PB: predicated region body
PF: predicated region fallthrough
CT: control target
= control target key end

     0   :  { %s5275_s0 = inlined_call_operand.vmem [shape: s32[2,2], index: 0, kind: input, shape index: {}]   ;;  %s5276_s1 = inlined_call_operand.vmem [shape: bf16[16,1,768], index: 1, kind: input, shape index: {}, may-alias: {1,2}]   ;;  %s5277_s2 = inlined_call_operand.vmem [shape: bf16[16,1,768], index: 2, kind: input, shape index: {}, may-alias: {1,2}]   ;;  %s5278_s3 = inlined_call_operand.hbm [shape: bf16[768,256], index: 3, kind: input, shape index: {}]   ;;  %s5279_s4 = inlined_call_operand.vmem [shape: f32[1,256], index: 4, kind: input, shape index: {}]   ;;  %s5280_s5 = inlined_call_operand.vmem [shape: bf16[3,32,32], index: 5, kind: input, shape index: {}]   ;;  %s5281_s6 = inlined_call_operand.vmem [shape: f32[3,1,32], index: 6, kind: input, shape index: {}]   ;;  %s5282_s7 = inlined_call_operand.vmem [shape: bf16[32,32], index: 7, kind: input, shape index: {}]   ;;  %s5283_s8 = inlined_call_operand.vmem [shape: f32[1,32], index: 8, kind: input, shape index: {}]   ;;  %s5284_s9 = inlined_call_operand.hbm [shape: bf16[256,768], index: 9, kind: input, shape index: {}]   ;;  %s5285_s10 = inlined_call_operand.vmem [shape: f32[1,768], index: 10, kind: input, shape index: {}]   ;;  %s5286_s11 = inlined_call_operand.hbm [shape: bf16[768,128], index: 11, kind: input, shape index: {}]   ;;  %s5287_s12 = inlined_call_operand.vmem [shape: f32[1,128], index: 12, kind: input, shape index: {}]   ;;  %s5288_s13 = inlined_call_operand.hbm [shape: f32[2,1,128], index: 13, kind: output, shape index: {}]  }
   0x1   :  { %5299 = sst [smem:[#allocation21_spill]] %s5284_s9  ;;  %s18_s27 = sshll.u32 %s5275_s0, 4  ;;  %s19_s27 = int_to_ptr.vmem [resolvable:$true] %s18_s27 }
   0x2   :  { %5300 = sst [smem:[#allocation22_spill]] %s5288_s13  ;;  %s4533_s28 = scalar_lea.vmem %s19_s27, 32 }
   0x3   :  { %p4534_p0 = scmp.ne.s32.totalorder %s19_s27, %s4533_s28  ;;  %p4538_p1 = scmp.lt.s32.totalorder %s19_s27, %s19_s27 }
   0x4   :  { %p4539_p2 = scmp.lt.s32.totalorder %s4533_s28, %s4533_s28 }
   0x6   :  { %p4540_p3 = por %p4539_p2, %p4538_p1 }
   0x8   :  { %p4541_p4 = pnand %p4540_p3, %p4534_p0 }
   0xa   :  { %4544 = shalt.err (!%p4541_p4)  }
   0xb   :  { %s4703_s29 = smov [#allocation3]  }
   0xc   :  { %21 = dma.vmem_to_smem %s19_s27, 32, %s4703_s29, [#allocation2] }
   0xd   :  { %4673 = dma.done.wait [#allocation2], 32 }
   0xe   :  { %4674 = vsyncadd [#allocation2], 4294967264 }
   0xf   :  { %23 = sfence }
  0x10   :  { %24 = vsyncpa [#allocation5], 0 }
  0x11   :  { %25 = vsyncpa [#allocation8], 0 }
  0x12   :  { %26 = vsyncpa [#allocation6], 0 }
  0x13   :  { %28 = vsyncpa [#allocation6 + $0x1], 0  ;;  %s4799_s30 = smov 0   ;;  %s4801_s0 = smov 0  }
  0x14   :  { %s4803_s14 = smov 0   ;;  %s4805_s15 = smov 0  }
  0x15 LB: > { %5301 = sst [smem:[#allocation15_spill]] %s4689_s30  ;;  %s4820_s16 = sadd.s32 4294967295, %s4701_s15   ;;  %s4701_s15 = sphi %s4805_s15, %s5332_s15   ;;  %s4697_s14 = sphi %s4803_s14, %s5334_s14   ;;  %s4693_s0 = sphi %s4801_s0, %s5336_s0   ;;  %s4689_s30 = sphi %s4799_s30, %s5335_s30  }
  0x16   : > { %5302 = sst [smem:[#allocation16_spill]] %s4697_s14  ;;  %s3589_s17 = sadd.s32 4294967294, %s4701_s15  }
  0x17   : > { %5303 = sst [smem:[#allocation17_spill]] %s4701_s15  ;;  %s4824_s18 = sadd.s32 1, %s4701_s15  }
  0x18   : > { %5304 = sst [smem:[#allocation18_spill]] %s4824_s18  ;;  %s313_s19 = sadd.s32 1, %s4697_s14 }
  0x19   : > { %s310_s20 = ssub.s32 %s4701_s15, %s4824_s18  ;;  %p323_p5 = scmp.ne.s32.totalorder %s4697_s14, %s4693_s0 }
  0x1a   : > { %p311_p6 = scmp.eq.s32.totalorder %s310_s20, 0  ;;  %p324_p7 = scmp.eq.s32.totalorder %s4820_s16, 1 }
  0x1b   : > { %p329_p8 = scmp.ne.s32.totalorder %s4693_s0, %s4689_s30  ;;  %p330_p9 = scmp.eq.s32.totalorder %s3589_s17, 1 }
  0x1c   : > { %s4835_s21 = scalar_select %p311_p6, %s4697_s14, %s313_s19  }
  0x1d   : > { %p4837_p10 = por %p324_p7, %p323_p5  ;;  %p4841_p11 = por %p330_p9, %p329_p8 }
  0x1e   : > { %5305 = sst [smem:[#allocation19_spill]] %s4835_s21  ;;  %p3594_p12 = scmp.ge.s32.totalorder %s4701_s15, 1 }
  0x1f   : > { %s5306_s22 = scalar_select %p4837_p10, 1, 0 }
  0x20   : > { %s5307_s23 = scalar_select %p4841_p11, 1, 0 }
  0x21   : > { %p337_p13 = scmp.lt.s32.totalorder %s4701_s15, 3  ;;  %p5292_p0 = scmp.eq.s32.totalorder %s4820_s16, 0 }
  0x22   : > { %5308 = sst [smem:[#allocation20_spill]] %s5307_s23  ;;  %s4704_s25 = smov [#allocation7]  }
  0x23   : > { %p4848_p1 = pnand %p3594_p12, %p337_p13  ;;  %s377_s26 = sshll.u32 %s4704_s25, 4  ;;  %s378_s26 = int_to_ptr.vmem [resolvable:$true] %s377_s26 }
  0x24   : > { %s4705_s28 = smov [#allocation4]   ;;  %s5311_s9 = sld [smem:[#allocation21_spill]] }
  0x25   : > { %s5309_s24 = scalar_select %p4848_p1, 1, 0 }
  0x26   : > { %p4086_p2 = pneg %p4848_p1  ;;  %s349_s29 = sshll.u32 %s4705_s28, 4  ;;  %s4860_s29 = int_to_ptr.vmem [resolvable:$true] %s349_s29 }
  0x28   : > { %p4856_p3 = pnand %p5292_p0, %p4086_p2 }
  0x2a   : > { %s4545_s20 = scalar_lea.hbm %s5311_s9, 12288  ;;  %p4870_p5 = pneg %p4856_p3 }
  0x2b   : > { %p4546_p4 = scmp.ne.s32.totalorder %s5311_s9, %s4545_s20  ;;  %p4552_p8 = scmp.lt.u32.totalorder %s4545_s20, %s5311_s9 }
  0x2d   : > { %p4548_p6 = pnand %p4870_p5, %p4546_p4 }
  0x2f   : > { %p4549_p7 = pneg %p4548_p6 }
  0x31   : > { %p4554_p9 = pnand %p4552_p8, %p4549_p7 }
  0x33   : > { %4557 = shalt.err (!%p4554_p9)
}
  0x34   : > { %s4558_s17 = scalar_lea.vmem %s378_s26, 12288  ;;  %p4566_p0 = scmp.lt.s32.totalorder %s378_s26, %s378_s26 }
  0x35   : > { %p4559_p12 = scmp.ne.s32.totalorder %s378_s26, %s4558_s17  ;;  %p4567_p11 = scmp.lt.s32.totalorder %s4558_s17, %s4558_s17 }
  0x37   : > { %p4561_p13 = pnand %p4559_p12, %p4870_p5  ;;  %p4568_p10 = por %p4567_p11, %p4566_p0 }
  0x39   : > { %p4562_p2 = pneg %p4561_p13 }
  0x3b   : > { %p4569_p1 = pnand %p4568_p10, %p4562_p2 }
  0x3d   : > { %4572 = shalt.err (!%p4569_p1)
}
  0x3e   : > { %s4706_s14 = smov 384   ;;  %s4707_s21 = smov 24  }
  0x3f   : > { %4092 = dma.hbm_to_vmem [thread:$0]  (!%p4856_p3), %s5311_s9, 12288, %s378_s26, [#allocation8], %s4706_s14, %s4706_s14, %s4707_s21  }
  0x40   : > { %s4573_s23 = scalar_lea.hbm %s5278_s3, 12288 }
  0x41   : > { %p4574_p4 = scmp.ne.s32.totalorder %s5278_s3, %s4573_s23  ;;  %p4580_p0 = scmp.lt.u32.totalorder %s4573_s23, %s5278_s3 }
  0x43   : > { %p4576_p10 = pnand %p4574_p4, %p4870_p5 }
  0x45   : > { %p4577_p11 = pneg %p4576_p10 }
  0x47   : > { %p4582_p1 = pnand %p4580_p0, %p4577_p11 }
  0x49   : > { %4585 = shalt.err (!%p4582_p1)
}
  0x4a   : > { %s4586_s26 = scalar_lea.vmem %s4860_s29, 12288  ;;  %p4594_p9 = scmp.lt.s32.totalorder %s4860_s29, %s4860_s29 }
  0x4b   : > { %p4587_p6 = scmp.ne.s32.totalorder %s4860_s29, %s4586_s26  ;;  %p4595_p12 = scmp.lt.s32.totalorder %s4586_s26, %s4586_s26 }
  0x4d   : > { %p4589_p7 = pnand %p4587_p6, %p4870_p5  ;;  %p4596_p13 = por %p4595_p12, %p4594_p9 }
  0x4f   : > { %p4590_p8 = pneg %p4589_p7 }
  0x51   : > { %p4597_p2 = pnand %p4596_p13, %p4590_p8 }
  0x53   : > { %4600 = shalt.err (!%p4597_p2)
}
  0x54   : > { %s4708_s30 = smov 128   ;;  %s4709_s13 = smov 8  }
  0x55   : > { %4089 = dma.hbm_to_vmem [thread:$0]  (!%p4856_p3), %s5278_s3, 12288, %s4860_s29, [#allocation5], %s4708_s30, %s4708_s30, %s4709_s13  }
  0x56   : > { %s4710_s14 = smov [#allocation9]   ;;  %s4601_s20 = scalar_lea.hbm %s5286_s11, 6144 }
  0x57   : > { %s393_s21 = sshll.u32 %s4710_s14, 4  ;;  %p4602_p4 = scmp.ne.s32.totalorder %s5286_s11, %s4601_s20  ;;  %s394_s21 = int_to_ptr.vmem [resolvable:$true] %s393_s21 }
  0x58   : > { %p4608_p0 = scmp.lt.u32.totalorder %s4601_s20, %s5286_s11 }
  0x59   : > { %p4604_p10 = pnand %p4602_p4, %p4870_p5 }
  0x5b   : > { %p4605_p11 = pneg %p4604_p10 }
  0x5d   : > { %p4610_p1 = pnand %p4608_p0, %p4605_p11 }
  0x5f   : > { %4613 = shalt.err (!%p4610_p1)
}
  0x60   : > { %s4614_s29 = scalar_lea.vmem %s394_s21, 6144  ;;  %p4622_p9 = scmp.lt.s32.totalorder %s394_s21, %s394_s21 }
  0x61   : > { %p4615_p6 = scmp.ne.s32.totalorder %s394_s21, %s4614_s29  ;;  %p4623_p12 = scmp.lt.s32.totalorder %s4614_s29, %s4614_s29 }
  0x63   : > { %p4617_p7 = pnand %p4615_p6, %p4870_p5  ;;  %p4624_p13 = por %p4623_p12, %p4622_p9 }
  0x65   : > { %p4618_p8 = pneg %p4617_p7 }
  0x67   : > { %p4625_p2 = pnand %p4624_p13, %p4618_p8 }
  0x69   : > { %4628 = shalt.err (!%p4625_p2)
}
  0x6a   : > { %s4711_s30 = smov 64   ;;  %s4712_s13 = smov 4  }
  0x6b   : > { %4095 = dma.hbm_to_vmem [thread:$0]  (!%p4856_p3), %s5286_s11, 6144, %s394_s21, [#allocation8], %s4711_s30, %s4711_s30, %s4712_s13  }
  0x6c   : > { %p5313_p4 = scmp.ne.s32.totalorder %s5309_s24, 0 }
  0x6d   : > { %p5314_p10 = scmp.eq.s32.totalorder (!%p5313_p4), %s4820_s16, 0 }
  0x6e   : > { %436 = sbr.rel (%p5313_p4) target bundleno = 3610 (0xe1a), region = 68 }
  0x75   : > { %4676 = dma.done.wait (%p5314_p10), [#allocation5], 12288   ;;  %p5315_p5 = pmov %p5314_p10 }
  0x77   : > { %4678 = vsyncadd (%p5315_p5), [#allocation5], 4294955008  ;;  %p5316_p11 = pmov %p5315_p5 }
  0x78   : > { %p5317_p0 = pmov %p5315_p5 }
  0x79   : > { %4680 = dma.done.wait (%p5316_p11), [#allocation8], 18432  }
  0x7a   : > { %4682 = vsyncadd (%p5317_p0), [#allocation8], 4294948864  ;;  %s3603_s27 = sshll.u32 %s4820_s16, 7  ;;  %v4171_v0 = vld [vmem:[#allocation4 + $0x4] ss:$8 sps:$4 sm:$0xff]   ;;  %v519_v9 = vlaneseq  ;;  %vm640_vm0 = vcmask 1040384  }
  0x7b   : > { %s502_s25 = sadd.s32 1, %s3603_s27  ;;  %s494_s23 = sld [smem:[#allocation3 + %s3603_s27]]  ;;  %v4173_v1 = vld [vmem:[#allocation4] ss:$8 sps:$4 sm:$0xff]   ;;  %1237 = vmatprep.subr.bf16.mxu0 %v4171_v0  ;;  %v4174_v2 = vld [vmem:[#allocation4 + $0x14] ss:$8 sps:$4 sm:$0xff]  }
  0x7c   : > { %s503_s14 = sld [smem:[#allocation3 + %s502_s25]]  ;;  %1238 = vmatpush1.bf16.msra.mxu0 %v4173_v1  ;;  %v4176_v3 = vld [vmem:[#allocation4 + $0x10] ss:$8 sps:$4 sm:$0xff]   ;;  %v4177_v4 = vld [vmem:[#allocation4 + $0x24] ss:$8 sps:$4 sm:$0xff]   ;;  %v4938_v13 = vshrl.u32 %v519_v9, 7 }
  0x7d   : > { %1239 = vmatprep.subr.bf16.mxu0 %v4174_v2  ;;  %v4179_v5 = vld [vmem:[#allocation4 + $0x20] ss:$8 sps:$4 sm:$0xff]   ;;  %v4180_v6 = vld [vmem:[#allocation4 + $0x34] ss:$8 sps:$4 sm:$0xff]   ;;  %v4713_v7 = vmov 1966171168  }
  0x7e   : > { %v517_v8 = vunpack.c.l.s4 %v4713_v7  ;;  %v4182_v10 = vld [vmem:[#allocation4 + $0x30] ss:$8 sps:$4 sm:$0xff]   ;;  %v4183_v11 = vld [vmem:[#allocation4 + $0x44] ss:$8 sps:$4 sm:$0xff]   ;;  %v4185_v14 = vld [vmem:[#allocation4 + $0x40] ss:$8 sps:$4 sm:$0xff]  }
  0x7f   : > { %v4186_v15 = vld [vmem:[#allocation4 + $0x54] ss:$8 sps:$4 sm:$0xff]   ;;  %v4188_v17 = vld [vmem:[#allocation4 + $0x50] ss:$8 sps:$4 sm:$0xff]   ;;  %v4189_v18 = vld [vmem:[#allocation4 + $0x64] ss:$8 sps:$4 sm:$0xff]  }
  0x80   : > { %1240 = vmatpush1.bf16.msra.mxu0 %v4176_v3  ;;  %v518_v12 = vunpack.c.0.s8 %v517_v8  ;;  %v4191_v23 = vld [vmem:[#allocation4 + $0x60] ss:$8 sps:$4 sm:$0xff]   ;;  %vm641_vm1 = vsmask.f32 256  ;;  %v4192_v24 = vld [vmem:[#allocation4 + $0x74] ss:$8 sps:$4 sm:$0xff]  }
  0x81   : > { %p495_p3 = scmp.lt.s32.totalorder %s494_s23, 15  ;;  %1241 = vmatprep.subr.bf16.mxu0 %v4177_v4  ;;  %vm4956_vm2 = vmand %vm640_vm0, %vm641_vm1  ;;  %v4194_v30 = vld [vmem:[#allocation4 + $0x70] ss:$8 sps:$4 sm:$0xff]   ;;  %v4195_v31 = vld [vmem:[#allocation4 + $0x84] ss:$8 sps:$4 sm:$0xff]   ;;  %s4715_s25 = smov 64  }
  0x82   : > { %p504_p1 = scmp.lt.s32.totalorder %s503_s14, 15  ;;  %v4947_v16 = vsub.s32 %v518_v12, %v4938_v13  ;;  %v4197_v34 = vld [vmem:[#allocation4 + $0x80] ss:$8 sps:$4 sm:$0xff]   ;;  %v4198_v35 = vld [vmem:[#allocation4 + $0x94] ss:$8 sps:$4 sm:$0xff]   ;;  %vm4716_vm3 = vmmov 0  }
  0x83   : > { %s5338_s23 = smov (!%p495_p3, %s494_s23), 15  ;;  %v4200_v36 = vld [vmem:[#allocation4 + $0x90] ss:$8 sps:$4 sm:$0xff]   ;;  %v4201_v37 = vld [vmem:[#allocation4 + $0xa4] ss:$8 sps:$4 sm:$0xff]   ;;  %vm1398_vm4 = vcmask 1041408  }
  0x84   : > { %s5340_s14 = smov (!%p504_p1, %s503_s14), 15  ;;  %1242 = vmatpush1.bf16.msra.mxu0 %v4179_v5  ;;  %s4070_s24 = smul.u32 6, %s5338_s23  ;;  %v4203_v38 = vld [vmem:[#allocation4 + $0xa0] ss:$8 sps:$4 sm:$0xff]   ;;  %v4204_v39 = vld [vmem:[#allocation4 + $0xb4] ss:$8 sps:$4 sm:$0xff]  }
  0x85   : > { %1243 = vmatprep.subr.bf16.mxu0 %v4180_v6  ;;  %s4071_s21 = smul.u32 6, %s5340_s14  ;;  %v4206_v40 = vld [vmem:[#allocation4 + $0xb0] ss:$8 sps:$4 sm:$0xff]   ;;  %v4207_v41 = vld [vmem:[#allocation4 + $0xc4] ss:$8 sps:$4 sm:$0xff]   ;;  %s4717_s23 = smov 96  }
  0x86   : > { %s498_s20 = scalar_lea.vmem %s5276_s1, %s4070_s24  ;;  %v4209_v42 = vld [vmem:[#allocation4 + $0xc0] ss:$8 sps:$4 sm:$0xff]   ;;  %v4210_v43 = vld [vmem:[#allocation4 + $0xd4] ss:$8 sps:$4 sm:$0xff]   ;;  %v4212_v44 = vld [vmem:[#allocation4 + $0xd0] ss:$8 sps:$4 sm:$0xff]  }
  0x87   : > { %s507_s26 = scalar_lea.vmem %s5277_s2, %s4071_s21  ;;  %v512_v19 = vld [vmem:[%s498_s20] sm:$0x3f]  ;;  %v4216_v50 = vld [vmem:[#allocation4 + $0xf4] ss:$8 sps:$4 sm:$0xff]   ;;  %v4218_v55 = vld [vmem:[#allocation4 + $0xf0] ss:$8 sps:$4 sm:$0xff]  }
  0x88   : > { %1244 = vmatpush1.bf16.msra.mxu0 %v4182_v10  ;;  %v513_v20 = vld [vmem:[%s507_s26] sm:$0x3f]  ;;  %v522_v21 = vrot.slane %v512_v19, %v4947_v16  ;;  %v515_v47 = vcombine.high %v512_v19, %v512_v19  ;;  %v4226_v6 = vld [vmem:[#allocation4 + $0x114] ss:$8 sps:$4 sm:$0xff]   ;;  %v4224_v9 = vld [vmem:[#allocation4 + $0x110] ss:$8 sps:$4 sm:$0xff]  }
  0x89   : > { %1245 = vmatprep.subr.bf16.mxu0 %v4183_v11  ;;  %v576_v22 = vrot.slane %v513_v20, %v4947_v16  ;;  %v4213_v45 = vld [vmem:[#allocation4 + $0xe4] ss:$8 sps:$4 sm:$0xff]   ;;  %v569_v46 = vcombine.high %v513_v20, %v513_v20  ;;  %v4215_v48 = vld [vmem:[#allocation4 + $0xe0] ss:$8 sps:$4 sm:$0xff]   ;;  %v4236_v19 = vld [vmem:[#allocation4 + $0x150] ss:$8 sps:$4 sm:$0xff]  }
  0x8a   : > { %v530_v25 = vcombine.high %v522_v21, %v522_v21  ;;  %v529_v53 = vrot.slane %v515_v47, %v4947_v16  ;;  %v4969_v56 = vrot.slane %v522_v21, %v4947_v16  ;;  %v4223_v58 = vld [vmem:[#allocation4 + $0x104] ss:$8 sps:$4 sm:$0xff]   ;;  %v4221_v2 = vld [vmem:[#allocation4 + $0x100] ss:$8 sps:$4 sm:$0xff]   ;;  %s4718_s14 = smov 32   ;;  %vm1407_vm6 = vcmask 1042432  }
  0x8b   : > { %v584_v26 = vcombine.high %v576_v22, %v576_v22  ;;  %v4964_v49 = vrot.slane %v576_v22, %v4947_v16  ;;  %v583_v52 = vrot.slane %v569_v46, %v4947_v16  ;;  %v4229_v11 = vld [vmem:[#allocation4 + $0x124] ss:$8 sps:$4 sm:$0xff]   ;;  %v4227_v12 = vld [vmem:[#allocation4 + $0x120] ss:$8 sps:$4 sm:$0xff]   ;;  %v4244_v22 = vld [vmem:[#allocation4 + $0x174] ss:$8 sps:$4 sm:$0xff]  }
  0x8c   : > { %1246 = vmatpush1.bf16.msra.mxu0 %v4185_v14  ;;  %v4952_v27 = vrot.slane %v530_v25, %v4947_v16  ;;  %v531_v61 = vcombine.high %v529_v53, %v529_v53  ;;  %v545_v4 = vrot.slane %v529_v53, %v4947_v16  ;;  %v4232_v14 = vld [vmem:[#allocation4 + $0x134] ss:$8 sps:$4 sm:$0xff]   ;;  %v4241_v20 = vld [vmem:[#allocation4 + $0x164] ss:$8 sps:$4 sm:$0xff]   ;;  %v4239_v21 = vld [vmem:[#allocation4 + $0x160] ss:$8 sps:$4 sm:$0xff]  }
  0x8d   : > { %1247 = vmatprep.subr.bf16.mxu0 %v4186_v15  ;;  %v606_v28 = vrot.slane %v584_v26, %v4947_v16  ;;  %v585_v54 = vcombine.high %v583_v52, %v583_v52  ;;  %v617_v57 = vshll.u32 %v4964_v49, 16  ;;  %v599_v63 = vrot.slane %v583_v52, %v4947_v16  ;;  %v4230_v15 = vld [vmem:[#allocation4 + $0x130] ss:$8 sps:$4 sm:$0xff]   ;;  %v4245_v25 = vld [vmem:[#allocation4 + $0x180] ss:$8 sps:$4 sm:$0xff]   ;;  %s4719_s9 = smov 120  }
  0x8e   : > { %v561_v59 = vcombine.high %v4952_v27, %v4952_v27  ;;  %v559_v0 = vrot.slane %v531_v61, %v4947_v16  ;;  %v4250_v26 = vld [vmem:[#allocation4 + $0x194] ss:$8 sps:$4 sm:$0xff]   ;;  %v4278_v52 = vld [vmem:[#allocation4 + $0x230] ss:$8 sps:$4 sm:$0xff]   ;;  %v4283_v53 = vld [vmem:[#allocation4 + $0x244] ss:$8 sps:$4 sm:$0xff]  }
  0x8f   : > { %v620_v32 = vshll.u32 %v606_v28, 16  ;;  %v615_v51 = vcombine.high %v606_v28, %v606_v28  ;;  %v613_v62 = vrot.slane %v585_v54, %v4947_v16  ;;  %v643_v3 = vsel %vm4956_vm2, %v4969_v56, %v617_v57  ;;  %v4235_v16 = vld [vmem:[#allocation4 + $0x144] ss:$8 sps:$4 sm:$0xff]   ;;  %v4274_v46 = vld [vmem:[#allocation4 + $0x214] ss:$8 sps:$4 sm:$0xff]   ;;  %s4720_s21 = smov 112  }
  0x90   : > { %1248 = vmatpush1.bf16.msra.mxu0 %v4188_v17  ;;  %v629_v5 = vshll.u32 %v599_v63, 16  ;;  %v4233_v17 = vld [vmem:[#allocation4 + $0x140] ss:$8 sps:$4 sm:$0xff]   ;;  %v4253_v28 = vld [vmem:[#allocation4 + $0x1a4] ss:$8 sps:$4 sm:$0xff]   ;;  %vm1416_vm9 = vcmask 1043456  }
  0x91   : > { %1249 = vmatprep.subr.bf16.mxu0 %v4189_v18  ;;  %v644_v33 = vsel %vm4956_vm2, %v4952_v27, %v620_v32  ;;  %v626_v60 = vshll.u32 %v615_v51, 16  ;;  %v632_v1 = vshll.u32 %v613_v62, 16  ;;  %v4238_v18 = vld [vmem:[#allocation4 + $0x154] ss:$8 sps:$4 sm:$0xff]   ;;  %v4248_v27 = vld [vmem:[#allocation4 + $0x190] ss:$8 sps:$4 sm:$0xff]  }
  0x92   : > { %1269 = vmatprep.mubr.bf16.mxu0 %v644_v33  ;;  %v4989_v10 = vsel %vm4956_vm2, %v545_v4, %v629_v5  ;;  %v4256_v32 = vld [vmem:[#allocation4 + $0x1b4] ss:$8 sps:$4 sm:$0xff]   ;;  %v4281_v54 = vld [vmem:[#allocation4 + $0x240] ss:$8 sps:$4 sm:$0xff]   ;;  %v4289_v57 = vld [vmem:[#allocation4 + $0x264] ss:$8 sps:$4 sm:$0xff]  }
  0x93   : > { %v646_v7 = vsel %vm4956_vm2, %v561_v59, %v626_v60  ;;  %v4985_v8 = vsel %vm4956_vm2, %v559_v0, %v632_v1  ;;  %v4280_v51 = vld [vmem:[#allocation4 + $0x234] ss:$8 sps:$4 sm:$0xff]   ;;  %v4290_v60 = vld [vmem:[#allocation4 + $0x270] ss:$8 sps:$4 sm:$0xff]   ;;  %v4295_v61 = vld [vmem:[#allocation4 + $0x284] ss:$8 sps:$4 sm:$0xff]  }
  0x94   : > { %1250 = vmatpush1.bf16.msra.mxu0 %v4191_v23  ;;  %v4242_v23 = vld [vmem:[#allocation4 + $0x170] ss:$8 sps:$4 sm:$0xff]   ;;  %v4292_v59 = vld [vmem:[#allocation4 + $0x274] ss:$8 sps:$4 sm:$0xff]   ;;  %v4293_v62 = vld [vmem:[#allocation4 + $0x280] ss:$8 sps:$4 sm:$0xff]  }
  0x95   : > { %1251 = vmatprep.subr.bf16.mxu0 %v4192_v24  ;;  %v4247_v24 = vld [vmem:[#allocation4 + $0x184] ss:$8 sps:$4 sm:$0xff]   ;;  %v4298_v63 = vld [vmem:[#allocation4 + $0x294] ss:$8 sps:$4 sm:$0xff]   ;;  %v4296_v0 = vld [vmem:[#allocation4 + $0x290] ss:$8 sps:$4 sm:$0xff]  }
  0x96   : > { %v4301_v1 = vld [vmem:[#allocation4 + $0x2a4] ss:$8 sps:$4 sm:$0xff]   ;;  %v4302_v4 = vld [vmem:[#allocation4 + $0x2b0] ss:$8 sps:$4 sm:$0xff]   ;;  %vm1399_vm5 = vsmask.f32 1280 }
  0x97   : > { %v4307_v5 = vld [vmem:[#allocation4 + $0x2c4] ss:$8 sps:$4 sm:$0xff]   ;;  %vm1408_vm7 = vsmask.f32 2304  ;;  %vm5042_vm8 = vmand %vm1398_vm4, %vm1399_vm5  ;;  %vm1417_vm10 = vsmask.f32 3328 }
  0x98   : > { %1252 = vmatpush1.bf16.msra.mxu0 %v4194_v30  ;;  %v614_v30 = vcombine.high %v4964_v49, %v4964_v49  ;;  %v4277_v49 = vld [vmem:[#allocation4 + $0x224] ss:$8 sps:$4 sm:$0xff]   ;;  %vm5051_vm11 = vmand %vm1407_vm6, %vm1408_vm7  ;;  %vm1483_vm13 = vcmask 261120   ;;  %vm1663_vm14 = vcmask 64512   ;;  %s4721_s18 = smov 104   ;;  %s4722_s19 = smov 8  }
  0x99   : > { %1253 = vmatprep.subr.bf16.mxu0 %v4195_v31  ;;  %v4251_v31 = vld [vmem:[#allocation4 + $0x1a0] ss:$8 sps:$4 sm:$0xff]   ;;  %vm5059_vm12 = vmand %vm1416_vm9, %vm1417_vm10  ;;  %s4723_s20 = smov 16   ;;  %s4724_s30 = smov 24   ;;  %vm2118_vm15 = vcmask 130048   ;;  %vm2217_vm1 = vcmask 785408  }
  0x9a   : > { %v623_v33 = vshll.u32 %v614_v30, 16  ;;  %v4318_v30 = vld [vmem:[%s5280_s5 + $0x8] sm:$0xff]   ;;  %s3879_s24 = sshll.u32 %s4820_s16, 4  ;;  %s5326_s28 = sld [smem:[#allocation22_spill]] }
  0x9b   : > { %p5327_p7 = scmp.ne.s32.totalorder %s5306_s22, 0  ;;  %s4725_s16 = smov [#allocation10]  }
  0x9c   : > { %1254 = vmatpush1.bf16.msra.mxu0 %v4197_v34  ;;  %v4254_v34 = vld [vmem:[#allocation4 + $0x1b0] ss:$8 sps:$4 sm:$0xff]  }
  0x9d   : > { %1255 = vmatprep.subr.bf16.mxu0 %v4198_v35  ;;  %v4259_v35 = vld [vmem:[#allocation4 + $0x1c4] ss:$8 sps:$4 sm:$0xff]  }
  0xa0   : > { %1256 = vmatpush1.bf16.msra.mxu0 %v4200_v36  ;;  %v4257_v36 = vld [vmem:[#allocation4 + $0x1c0] ss:$8 sps:$4 sm:$0xff]   ;;  %s5233_s17 = scalar_lea.hbm %s5326_s28, %s3879_s24 }
  0xa1   : > { %1257 = vmatprep.subr.bf16.mxu0 %v4201_v37  ;;  %v4262_v37 = vld [vmem:[#allocation4 + $0x1d4] ss:$8 sps:$4 sm:$0xff]  }
  0xa4   : > { %1258 = vmatpush1.bf16.msra.mxu0 %v4203_v38  ;;  %v4260_v38 = vld [vmem:[#allocation4 + $0x1d0] ss:$8 sps:$4 sm:$0xff]  }
  0xa5   : > { %1259 = vmatprep.subr.bf16.mxu0 %v4204_v39  ;;  %v4265_v39 = vld [vmem:[#allocation4 + $0x1e4] ss:$8 sps:$4 sm:$0xff]  }
  0xa8   : > { %1260 = vmatpush1.bf16.msra.mxu0 %v4206_v40  ;;  %v4263_v40 = vld [vmem:[#allocation4 + $0x1e0] ss:$8 sps:$4 sm:$0xff]  }
  0xa9   : > { %1261 = vmatprep.subr.bf16.mxu0 %v4207_v41  ;;  %v4268_v41 = vld [vmem:[#allocation4 + $0x1f4] ss:$8 sps:$4 sm:$0xff]  }
  0xac   : > { %1262 = vmatpush1.bf16.msra.mxu0 %v4209_v42  ;;  %v4266_v42 = vld [vmem:[#allocation4 + $0x1f0] ss:$8 sps:$4 sm:$0xff]  }
  0xad   : > { %1263 = vmatprep.subr.bf16.mxu0 %v4210_v43  ;;  %v4271_v43 = vld [vmem:[#allocation4 + $0x204] ss:$8 sps:$4 sm:$0xff]  }
  0xb0   : > { %1264 = vmatpush1.bf16.msra.mxu0 %v4212_v44  ;;  %v560_v44 = vcombine.high %v4969_v56, %v4969_v56  ;;  %v4284_v56 = vld [vmem:[#allocation4 + $0x250] ss:$8 sps:$4 sm:$0xff]  }
  0xb1   : > { %1265 = vmatprep.subr.bf16.mxu0 %v4213_v45  ;;  %v4269_v45 = vld [vmem:[#allocation4 + $0x200] ss:$8 sps:$4 sm:$0xff]  }
  0xb2   : > { %v645_v47 = vsel %vm4956_vm2, %v560_v44, %v623_v33 }
  0xb4   : > { %1266 = vmatpush1.bf16.msra.mxu0 %v4215_v48  ;;  %v4272_v48 = vld [vmem:[#allocation4 + $0x210] ss:$8 sps:$4 sm:$0xff]  }
  0xb5   : > { %1267 = vmatprep.subr.bf16.mxu0 %v4216_v50  ;;  %v4275_v50 = vld [vmem:[#allocation4 + $0x220] ss:$8 sps:$4 sm:$0xff]  }
  0xb8   : > { %1268 = vmatpush1.bf16.msra.mxu0 %v4218_v55  ;;  %v4286_v55 = vld [vmem:[#allocation4 + $0x254] ss:$8 sps:$4 sm:$0xff]  }
  0xb9   : > { %1278 = vmatprep.subr.bf16.mxu0 %v4223_v58  ;;  %v4287_v58 = vld [vmem:[#allocation4 + $0x260] ss:$8 sps:$4 sm:$0xff]  }
  0xbb   : > { %1270 = vmatmul.mubr.bf16.vlgmr.msra.gmra.mrb[0].mxu0 %v643_v3  ;;  %v4304_v3 = vld [vmem:[#allocation4 + $0x2b4] ss:$8 sps:$4 sm:$0xff]  }
  0xbc   : > { %1279 = vmatpush1.bf16.msra.mxu0 %v4221_v2  ;;  %1310 = vmatprep.mubr.bf16.mxu0 %v646_v7  ;;  %v4299_v2 = vld [vmem:[#allocation4 + $0x2a0] ss:$8 sps:$4 sm:$0xff]   ;;  %v4310_v7 = vld [vmem:[#allocation4 + $0x2d4] ss:$8 sps:$4 sm:$0xff]  }
  0xbd   : > { %1280 = vmatprep.subr.bf16.mxu0 %v4226_v6  ;;  %v4305_v6 = vld [vmem:[#allocation4 + $0x2c0] ss:$8 sps:$4 sm:$0xff]  }
  0xc0   : > { %1281 = vmatpush1.bf16.msra.mxu0 %v4224_v9  ;;  %v4313_v9 = vld [vmem:[#allocation4 + $0x2e4] ss:$8 sps:$4 sm:$0xff]  }
  0xc1   : > { %1282 = vmatprep.subr.bf16.mxu0 %v4229_v11  ;;  %v4311_v11 = vld [vmem:[#allocation4 + $0x2e0] ss:$8 sps:$4 sm:$0xff]  }
  0xc4   : > { %1283 = vmatpush1.bf16.msra.mxu0 %v4227_v12  ;;  %v4316_v12 = vld [vmem:[#allocation4 + $0x2f4] ss:$8 sps:$4 sm:$0xff]  }
  0xc5   : > { %1284 = vmatprep.subr.bf16.mxu0 %v4232_v14  ;;  %v4314_v14 = vld [vmem:[#allocation4 + $0x2f0] ss:$8 sps:$4 sm:$0xff]  }
  0xc8   : > { %1285 = vmatpush1.bf16.msra.mxu0 %v4230_v15  ;;  %v749_v15 = vsub.s32 0, %v4938_v13 }
  0xc9   : > { %1286 = vmatprep.subr.bf16.mxu0 %v4235_v16  ;;  %v745_v16 = vld [vmem:[%s5279_s4] sm:$0x3] }
  0xcc   : > { %1287 = vmatpush1.bf16.msra.mxu0 %v4233_v17  ;;  %v753_v17 = vsub.s32 1, %v4938_v13 }
  0xcd   : > { %1288 = vmatprep.subr.bf16.mxu0 %v4238_v18  ;;  %v750_v18 = vrot.slane %v745_v16, %v749_v15 }
  0xd0   : > { %1289 = vmatpush1.bf16.msra.mxu0 %v4236_v19  ;;  %v754_v19 = vrot.slane %v745_v16, %v753_v17 }
  0xd1   : > { %1290 = vmatprep.subr.bf16.mxu0 %v4241_v20  ;;  %v4317_v20 = vld [vmem:[%s5280_s5] sm:$0xff]  }
  0xd4   : > { %1291 = vmatpush1.bf16.msra.mxu0 %v4239_v21 }
  0xd5   : > { %1292 = vmatprep.subr.bf16.mxu0 %v4244_v22 }
  0xd8   : > { %1293 = vmatpush1.bf16.msra.mxu0 %v4242_v23 }
  0xd9   : > { %1294 = vmatprep.subr.bf16.mxu0 %v4247_v24 }
  0xdc   : > { %1295 = vmatpush1.bf16.msra.mxu0 %v4245_v25 }
  0xdd   : > { %1296 = vmatprep.subr.bf16.mxu0 %v4250_v26 }
  0xe0   : > { %1297 = vmatpush1.bf16.msra.mxu0 %v4248_v27 }
  0xe1   : > { %1298 = vmatprep.subr.bf16.mxu0 %v4253_v28 }
  0xe4   : > { %1299 = vmatpush1.bf16.msra.mxu0 %v4251_v31 }
  0xe5   : > { %1300 = vmatprep.subr.bf16.mxu0 %v4256_v32 }
  0xe8   : > { %1301 = vmatpush1.bf16.msra.mxu0 %v4254_v34 }
  0xe9   : > { %1302 = vmatprep.subr.bf16.mxu0 %v4259_v35 }
  0xec   : > { %1303 = vmatpush1.bf16.msra.mxu0 %v4257_v36 }
  0xed   : > { %1304 = vmatprep.subr.bf16.mxu0 %v4262_v37 }
  0xf0   : > { %1305 = vmatpush1.bf16.msra.mxu0 %v4260_v38 }
  0xf1   : > { %1306 = vmatprep.subr.bf16.mxu0 %v4265_v39 }
  0xf4   : > { %1307 = vmatpush1.bf16.msra.mxu0 %v4263_v40 }
  0xf5   : > { %1308 = vmatprep.subr.bf16.mxu0 %v4268_v41 }
  0xf8   : > { %1309 = vmatpush1.bf16.msra.mxu0 %v4266_v42 }
  0xf9   : > { %1319 = vmatprep.subr.bf16.mxu0 %v4271_v43 }
  0xfb   : > { %1311 = vmatmul.mubr.bf16.vlgmr.msra.gmra.mrb[0].mxu0 %v645_v47 }
  0xfc   : > { %1320 = vmatpush1.bf16.msra.mxu0 %v4269_v45  ;;  %1351 = vmatprep.mubr.bf16.mxu0 %v4985_v8  ;;  %v4308_v8 = vld [vmem:[#allocation4 + $0x2d0] ss:$8 sps:$4 sm:$0xff]  }
  0xfd   : > { %1321 = vmatprep.subr.bf16.mxu0 %v4274_v46 }
 0x100   : > { %1322 = vmatpush1.bf16.msra.mxu0 %v4272_v48 }
 0x101   : > { %1323 = vmatprep.subr.bf16.mxu0 %v4277_v49 }
 0x104   : > { %1324 = vmatpush1.bf16.msra.mxu0 %v4275_v50 }
 0x105   : > { %1325 = vmatprep.subr.bf16.mxu0 %v4280_v51 }
 0x108   : > { %1326 = vmatpush1.bf16.msra.mxu0 %v4278_v52 }
 0x109   : > { %1327 = vmatprep.subr.bf16.mxu0 %v4283_v53 }
 0x10c   : > { %1328 = vmatpush1.bf16.msra.mxu0 %v4281_v54 }
 0x10d   : > { %1329 = vmatprep.subr.bf16.mxu0 %v4286_v55 }
 0x110   : > { %1330 = vmatpush1.bf16.msra.mxu0 %v4284_v56 }
 0x111   : > { %1331 = vmatprep.subr.bf16.mxu0 %v4289_v57 }
 0x114   : > { %1332 = vmatpush1.bf16.msra.mxu0 %v4287_v58 }
 0x115   : > { %1333 = vmatprep.subr.bf16.mxu0 %v4292_v59 }
 0x118   : > { %1334 = vmatpush1.bf16.msra.mxu0 %v4290_v60 }
 0x119   : > { %1335 = vmatprep.subr.bf16.mxu0 %v4295_v61 }
 0x11c   : > { %1336 = vmatpush1.bf16.msra.mxu0 %v4293_v62 }
 0x11d   : > { %1337 = vmatprep.subr.bf16.mxu0 %v4298_v63  ;;  %v4319_v63 = vld [vmem:[%s5280_s5 + $0x10] sm:$0xff]  }
 0x120   : > { %1338 = vmatpush1.bf16.msra.mxu0 %v4296_v0 }
 0x121   : > { %1339 = vmatprep.subr.bf16.mxu0 %v4301_v1 }
 0x124   : > { %1340 = vmatpush1.bf16.msra.mxu0 %v4299_v2 }
 0x125   : > { %1341 = vmatprep.subr.bf16.mxu0 %v4304_v3 }
 0x128   : > { %1342 = vmatpush1.bf16.msra.mxu0 %v4302_v4 }
 0x129   : > { %1343 = vmatprep.subr.bf16.mxu0 %v4307_v5 }
 0x12c   : > { %1344 = vmatpush1.bf16.msra.mxu0 %v4305_v6 }
 0x12d   : > { %1345 = vmatprep.subr.bf16.mxu0 %v4310_v7  ;;  %v4320_v7 = vld [vmem:[%s5280_s5 + $0x18] sm:$0xff]  }
 0x130   : > { %1346 = vmatpush1.bf16.msra.mxu0 %v4308_v8 }
 0x131   : > { %1347 = vmatprep.subr.bf16.mxu0 %v4313_v9 }
 0x134   : > { %1348 = vmatpush1.bf16.msra.mxu0 %v4311_v11 }
 0x135   : > { %1349 = vmatprep.subr.bf16.mxu0 %v4316_v12  ;;  %v4321_v12 = vld [vmem:[%s5280_s5 + $0x20] sm:$0xff]  }
 0x138   : > { %1350 = vmatpush1.bf16.msra.mxu0 %v4314_v14 }
 0x13b   : > { %1352 = vmatmul.mubr.bf16.vlgmr.msra.gmra.mrb[0].mxu0 %v4989_v10  ;;  %v4714_v10 = vmov 0.0  }
 0x13c   : > { %3980 = vmatprep.subr.bf16.mxu1 %v4714_v10  ;;  %3984 = vmatprep.mubr.msk.bf16.mxu1 %vm4716_vm3, %v4714_v10 }
 0x13d   : > { %3981 = vmatpush3.bf16.msra.mxu1 %v4317_v20 }
 0x13e   : > { %3982 = vmatprep.subr.bf16.mxu1 %v4714_v10 }
 0x141   : > { %3983 = vmatpush3.bf16.msra.mxu1 %v4318_v30 }
 0x142   : > { %3988 = vmatprep.subr.bf16.mxu1 %v4714_v10 }
 0x20e   : > { %v1353_v21 = vpop.f32.mrb[0].mxu0 }
 0x20f   : > { %v4060_v22 = vadd.f32 %v1353_v21, %v750_v18  ;;  %v1355_v23 = vpop.f32.mrb[1].mxu0 }
 0x210   : > { %v4061_v24 = vadd.f32 %v1355_v23, %v754_v19  ;;  %v1357_v25 = vpop.f32.mrb[2].mxu0  ;;  %v4322_v19 = vld [vmem:[%s5280_s5 + $0x28] sm:$0xff]  }
 0x211   : > { %v5013_v26 = vpack.c.bf16 %v4060_v22, %v4060_v22  ;;  %v1358_v27 = vpop.f32.mrb[3].mxu0  ;;  %v3701_v25 = vld [vmem:[%s5281_s6] ss:$0 sm:$0xff] }
 0x212   : > { %v5015_v28 = vpack.c.bf16 %v4061_v24, %v4061_v24  ;;  %v3710_v24 = vld [vmem:[%s5281_s6 + $0x1] ss:$0 sm:$0xff] }
 0x213   : > { %v1363_v31 = vshll.u32 %v5013_v26, 16  ;;  %v1420_v39 = vshrl.u32 %v5013_v26, 16  ;;  %v1369_v40 = vrot.slane %v5013_v26, 7 }
 0x214   : > { %v1385_v32 = vrot.slane %v5015_v28, 5  ;;  %v1379_v33 = vshll.u32 %v5015_v28, 16  ;;  %v1377_v42 = vrot.slane %v5015_v28, 6  ;;  %v1432_v43 = vshrl.u32 %v5015_v28, 16 }
 0x215   : > { %v1372_v34 = vrot.slane %v1363_v31, 7  ;;  %v1426_v41 = vrot.slane %v1420_v39, 7 }
 0x216   : > { %1386 = vrot.lane.b32.xlu1 %v1385_v32, %s4715_s25  ;;  %v1381_v35 = vrot.slane %v1379_v33, 6  ;;  %v1388_v36 = vrot.slane %v1379_v33, 5  ;;  %v1438_v44 = vrot.slane %v1432_v43, 5  ;;  %v1434_v4 = vrot.slane %v1432_v43, 6 }
 0x218   : > { %v4161_v37 = vpack.i.bf16 %v1381_v35, %v1363_v31  ;;  %v4166_v38 = vpack.i.bf16 %v1388_v36, %v1372_v34  ;;  %v3719_v35 = vld [vmem:[%s5281_s6 + $0x2] ss:$0 sm:$0xff] }
 0x21a   : > { %4162 = vrot.lane.b32.xlu0 %v4161_v37, %s4717_s23  ;;  %4167 = vrot.lane.b32.xlu1 %v4166_v38, %s4718_s14 }
 0x21e   : > { %1370 = vrot.lane.b32.xlu0 %v1369_v40, %s4715_s25  ;;  %1427 = vrot.lane.b32.xlu1 %v1426_v41, %s4715_s25 }
 0x222   : > { %1423 = vrot.lane.b32.xlu0 %v5013_v26, %s4717_s23  ;;  %1435 = vrot.lane.b32.xlu1 %v1377_v42, %s4717_s23 }
 0x226   : > { %1429 = vrot.lane.b32.xlu0 %v1369_v40, %s4718_s14  ;;  %1441 = vrot.lane.b32.xlu1 %v1385_v32, %s4718_s14 }
 0x22a   : > { %1439 = vrot.lane.b32.xlu0 %v1438_v44, %s4715_s25 }
 0x288   : > { %v1387_v45 = vpop.permute.xlu1 %1386 }
 0x28c   : > { %v4163_v46 = vpop.permute.xlu0 %4162  ;;  %v4168_v47 = vpop.permute.xlu1 %4167 }
 0x28d   : > { %v4164_v48 = vunpack.i.l.bf16 %v4163_v46  ;;  %v4169_v51 = vunpack.i.l.bf16 %v4168_v47  ;;  %v4165_v56 = vunpack.i.h.bf16 %v4163_v46  ;;  %v4170_v60 = vunpack.i.h.bf16 %v4168_v47 }
 0x28f   : > { %v1392_v50 = vsel %vm4956_vm2, %v5013_v26, %v4164_v48 }
 0x290   : > { %v1371_v52 = vpop.permute.xlu0 %1370  ;;  %v1428_v54 = vpop.permute.xlu1 %1427 }
 0x291   : > { %v1396_v53 = vsel %vm640_vm0, %v1392_v50, %v1371_v52 }
 0x292   : > { %v1401_v57 = vsel %vm5042_vm8, %v1396_v53, %v4169_v51 }
 0x293   : > { %v1405_v58 = vsel %vm1398_vm4, %v1401_v57, %v1377_v42 }
 0x294   : > { %v1424_v61 = vpop.permute.xlu0 %1423  ;;  %v1410_v62 = vsel %vm5051_vm11, %v1405_v58, %v4165_v56  ;;  %v1436_v3 = vpop.permute.xlu1 %1435 }
 0x295   : > { %v1444_v0 = vsel %vm4956_vm2, %v1420_v39, %v1424_v61  ;;  %v1414_v1 = vsel %vm1407_vm6, %v1410_v62, %v1387_v45  ;;  %vm2214_vm2 = vcmask 523264  }
 0x296   : > { %v1419_v2 = vsel %vm5059_vm12, %v1414_v1, %v4170_v60  ;;  %v1447_v6 = vsel %vm640_vm0, %v1444_v0, %v1428_v54  ;;  %vm2121_vm0 = vcmask 195584  }
 0x297   : > { %3985 = vmatmul.mubr.msk.bf16.vlgmr.msra.gmra.mrb[0].mxu1 %vm1483_vm13, %v1419_v2 }
 0x298   : > { %v1430_v5 = vpop.permute.xlu0 %1429  ;;  %3989 = vmatpush3.bf16.msra.mxu1 %v4319_v63  ;;  %3992 = vmatprep.mubr.msk.bf16.mxu1 %vm4716_vm3, %v4714_v10  ;;  %v1442_v14 = vpop.permute.xlu1 %1441 }
 0x299   : > { %v1449_v29 = vsel %vm5042_vm8, %v1447_v6, %v1430_v5  ;;  %3990 = vmatprep.subr.bf16.mxu1 %v4714_v10 }
 0x29a   : > { %v1452_v8 = vsel %vm1398_vm4, %v1449_v29, %v1434_v4 }
 0x29b   : > { %v1454_v9 = vsel %vm5051_vm11, %v1452_v8, %v1436_v3 }
 0x29c   : > { %v1440_v11 = vpop.permute.xlu0 %1439  ;;  %3991 = vmatpush3.bf16.msra.mxu1 %v4320_v7 }
 0x29d   : > { %v1457_v16 = vsel %vm1407_vm6, %v1454_v9, %v1440_v11  ;;  %3996 = vmatprep.subr.bf16.mxu1 %v4714_v10 }
 0x29e   : > { %v1459_v18 = vsel %vm5059_vm12, %v1457_v16, %v1442_v14 }
 0x29f   : > { %3993 = vmatmul.mubr.msk.bf16.vlgmr.msra.gmra.mrb[4].mxu1 %vm1483_vm13, %v1459_v18 }
 0x2a0   : > { %3997 = vmatpush3.bf16.msra.mxu1 %v4321_v12  ;;  %4000 = vmatprep.mubr.msk.bf16.mxu1 %vm4716_vm3, %v4714_v10 }
 0x2a1   : > { %3998 = vmatprep.subr.bf16.mxu1 %v4714_v10 }
 0x2a4   : > { %3999 = vmatpush3.bf16.msra.mxu1 %v4322_v19 }
 0x2a5   : > { %4004 = vmatprep.subr.bf16.mxu1 %v4714_v10 }
 0x2a7   : > { %4001 = vmatmul.mubr.msk.bf16.vlgmr.msra.gmra.mrb[8].mxu1 %vm1483_vm13, %v1459_v18 }
 0x2a8   : > { %4006 = vmatprep.mubr.msk.bf16.mxu1 %vm4716_vm3, %v4714_v10 }
 0x36a   : > { %v1521_v20 = vpop.f32.mrb[0].mxu1 }
 0x36b   : > { %v3986_v21 = vpop.f32.mrb[1].mxu1  ;;  %v1522_v31 = vadd.f32 %v3701_v25, %v1521_v20 }
 0x36c   : > { %v1524_v22 = vpop.f32.mrb[2].mxu1 }
 0x36d   : > { %v3987_v23 = vpop.f32.mrb[3].mxu1  ;;  %v1660_v36 = vpack.c.bf16 %v1522_v31, %v1522_v31 }
 0x372   : > { %v1589_v26 = vpop.f32.mrb[4].mxu1 }
 0x373   : > { %v1590_v27 = vadd.f32 %v3710_v24, %v1589_v26  ;;  %v3994_v28 = vpop.f32.mrb[5].mxu1 }
 0x374   : > { %v1592_v30 = vpop.f32.mrb[6].mxu1 }
 0x375   : > { %v1661_v32 = vpack.c.bf16 %v1590_v27, %v1590_v27  ;;  %v3995_v33 = vpop.f32.mrb[7].mxu1 }
 0x377   : > { %1774 = vrot.lane.b32.xlu1 %v1661_v32, %s4719_s9  ;;  %v1668_v34 = vsel %vm1663_vm14, %v1661_v32, 0 }
 0x378   : > { %4005 = vmatpush3.bf16.xpose.msra.mxu1 %v1668_v34 }
 0x379   : > { %4010 = vmatprep.subr.bf16.mxu1 %v4714_v10 }
 0x37a   : > { %v1654_v37 = vpop.f32.mrb[8].mxu1 }
 0x37b   : > { %v1655_v38 = vadd.f32 %v3719_v35, %v1654_v37  ;;  %1771 = vrot.lane.b32.xlu1 %v1660_v36, %s4719_s9  ;;  %v4002_v39 = vpop.f32.mrb[9].mxu1 }
 0x37c   : > { %v1657_v40 = vpop.f32.mrb[10].mxu1 }
 0x37d   : > { %v5115_v41 = vpack.c.bf16 %v1655_v38, %v1655_v38  ;;  %v4003_v42 = vpop.f32.mrb[11].mxu1 }
 0x37f   : > { %4007 = vmatmul.mubr.msk.bf16.vlgmr.msra.gmra.mrb[12].mxu1 %vm1663_vm14, %v1660_v36  ;;  %v1725_v43 = vsel %vm1416_vm9, %v5115_v41, 0 }
 0x380   : > { %4011 = vmatpush3.bf16.msra.mxu1 %v1725_v43  ;;  %4012 = vmatprep.mubr.msk.bf16.mxu1 %vm4716_vm3, %v4714_v10 }
 0x381   : > { %4016 = vmatprep.subr.bf16.mxu1 %v4714_v10 }
 0x3e9   : > { %v1775_v53 = vpop.permute.xlu1 %1774 }
 0x3ea   : > { %v1780_v55 = vsel %vm1663_vm14, %v1775_v53, 0 }
 0x3ed   : > { %v1772_v57 = vpop.permute.xlu1 %1771 }
 0x452   : > { %v1704_v44 = vpop.f32.mrb[12].mxu1 }
 0x453   : > { %v4008_v45 = vpop.f32.mrb[13].mxu1  ;;  %v1710_v46 = vsel %vm1663_vm14, %v1704_v44, -inf }
 0x454   : > { %1711 = vmax.xlane.f32.xlu0 %v1710_v46  ;;  %v1707_v47 = vpop.f32.mrb[14].mxu1 }
 0x455   : > { %v4009_v48 = vpop.f32.mrb[15].mxu1 }
 0x46a   : > { %1833 = vrot.lane.b32.xlu0 %v5115_v41, %s4719_s9 }
 0x46e   : > { %1884 = vrot.lane.b32.xlu0 %v1660_v36, %s4720_s21 }
 0x4e1   : > { %v1712_v49 = vpop.xlane.xlu0 %1711 }
 0x4e2   : > { %v1713_v50 = vsub.f32 %v1704_v44, %v1712_v49 }
 0x4e4   : > { %v1714_v51 = vmul.f32 1.442695, %v1713_v50 }
 0x4e5   : > { %v1834_v56 = vpop.permute.xlu0 %1833 }
 0x4e6   : > { %4517 = vpow2.f32 %v1714_v51  ;;  %v1839_v58 = vsel %vm1416_vm9, %v1834_v56, 0 }
 0x4e9   : > { %v1885_v12 = vpop.permute.xlu0 %1884 }
 0x4f0   : > { %v5126_v52 = vpop.eup %4517 }
 0x4f1   : > { %v1719_v54 = vpack.c.bf16 %v5126_v52, %v5126_v52  ;;  %v1716_v56 = vsel %vm1663_vm14, %v5126_v52, 0.0  ;;  %v4324_v52 = vld [vmem:[%s5282_s7 + $0x8] sm:$0xff]  }
 0x4f3   : > { %4013 = vmatmul.mubr.msk.bf16.vlgmr.msra.gmra.mrb[16].mxu1 %vm1663_vm14, %v1719_v54 }
 0x4f4   : > { %4017 = vmatpush3.bf16.xpose.msra.mxu1 %v1780_v55  ;;  %4018 = vmatprep.mubr.msk.bf16.mxu1 %vm4716_vm3, %v4714_v10 }
 0x4f5   : > { %4022 = vmatprep.subr.bf16.mxu1 %v4714_v10 }
 0x4fb   : > { %4019 = vmatmul.mubr.msk.bf16.vlgmr.msra.gmra.mrb[20].mxu1 %vm1663_vm14, %v1772_v57 }
 0x4fc   : > { %4023 = vmatpush3.bf16.msra.mxu1 %v1839_v58  ;;  %4024 = vmatprep.mubr.msk.bf16.mxu1 %vm4716_vm3, %v4714_v10 }
 0x4fd   : > { %4028 = vmatprep.subr.bf16.mxu1 %v4714_v10 }
 0x5c6   : > { %v5140_v59 = vpop.f32.mrb[16].mxu1 }
 0x5c7   : > { %v4014_v60 = vpop.f32.mrb[17].mxu1 }
 0x5c8   : > { %v1764_v61 = vpop.f32.mrb[18].mxu1 }
 0x5c9   : > { %v4015_v62 = vpop.f32.mrb[19].mxu1 }
 0x5ce   : > { %v1816_v63 = vpop.f32.mrb[20].mxu1 }
 0x5cf   : > { %v4020_v0 = vpop.f32.mrb[21].mxu1  ;;  %v1822_v1 = vsel %vm1663_vm14, %v1816_v63, -inf }
 0x5d0   : > { %1823 = vmax.xlane.f32.xlu1 %v1822_v1  ;;  %v1819_v2 = vpop.f32.mrb[22].mxu1  ;;  %v4323_v1 = vld [vmem:[%s5282_s7] sm:$0xff]  }
 0x5d1   : > { %v4021_v3 = vpop.f32.mrb[23].mxu1 }
 0x5e1   : > { %1886 = vrot.lane.b32.xlu1 %v1661_v32, %s4720_s21 }
 0x5e5   : > { %1944 = vrot.lane.b32.xlu1 %v5115_v41, %s4720_s21 }
 0x5e9   : > { %1997 = vrot.lane.b32.xlu1 %v1661_v32, %s4721_s18 }
 0x5ed   : > { %1995 = vrot.lane.b32.xlu1 %v1660_v36, %s4721_s18 }
 0x65d   : > { %v1824_v4 = vpop.xlane.xlu1 %1823 }
 0x65e   : > { %v1825_v5 = vsub.f32 %v1816_v63, %v1824_v4 }
 0x660   : > { %v1826_v6 = vmul.f32 1.442695, %v1825_v5 }
 0x661   : > { %v1887_v29 = vpop.permute.xlu1 %1886 }
 0x662   : > { %4519 = vpow2.f32 %v1826_v6  ;;  %v1892_v9 = vsel %vm1663_vm14, %v1887_v29, 0 }
 0x665   : > { %v1945_v11 = vpop.permute.xlu1 %1944 }
 0x666   : > { %v1950_v14 = vsel %vm1416_vm9, %v1945_v11, 0 }
 0x669   : > { %v1998_v31 = vpop.permute.xlu1 %1997 }
 0x66a   : > { %v2003_v34 = vsel %vm1663_vm14, %v1998_v31, 0  ;;  %v4342_v31 = vld [vmem:[#allocation7 + $0x74] ss:$24 sps:$4 sm:$0xff]  }
 0x66c   : > { %v4520_v7 = vpop.eup %4519 }
 0x66d   : > { %v1831_v8 = vpack.c.bf16 %v4520_v7, %v4520_v7  ;;  %v1996_v36 = vpop.permute.xlu1 %1995  ;;  %v1828_v47 = vsel %vm1663_vm14, %v4520_v7, 0.0 }
 0x66f   : > { %4025 = vmatmul.mubr.msk.bf16.vlgmr.msra.gmra.mrb[24].mxu1 %vm1663_vm14, %v1831_v8 }
 0x670   : > { %4029 = vmatpush3.bf16.xpose.msra.mxu1 %v1892_v9  ;;  %4030 = vmatprep.mubr.msk.bf16.mxu1 %vm4716_vm3, %v4714_v10 }
 0x671   : > { %4034 = vmatprep.subr.bf16.mxu1 %v4714_v10 }
 0x677   : > { %4031 = vmatmul.mubr.msk.bf16.vlgmr.msra.gmra.mrb[28].mxu1 %vm1663_vm14, %v1885_v12 }
 0x678   : > { %4035 = vmatpush3.bf16.msra.mxu1 %v1950_v14  ;;  %4036 = vmatprep.mubr.msk.bf16.mxu1 %vm4716_vm3, %v4714_v10 }
 0x679   : > { %4040 = vmatprep.subr.bf16.mxu1 %v4714_v10 }
 0x742   : > { %v1875_v16 = vpop.f32.mrb[24].mxu1 }
 0x743   : > { %v4026_v18 = vpop.f32.mrb[25].mxu1 }
 0x744   : > { %v1878_v19 = vpop.f32.mrb[26].mxu1 }
 0x745   : > { %v4027_v20 = vpop.f32.mrb[27].mxu1 }
 0x74a   : > { %v1928_v21 = vpop.f32.mrb[28].mxu1 }
 0x74b   : > { %v4032_v22 = vpop.f32.mrb[29].mxu1  ;;  %v1934_v23 = vsel %vm1663_vm14, %v1928_v21, -inf }
 0x74c   : > { %1935 = vmax.xlane.f32.xlu0 %v1934_v23  ;;  %v1931_v24 = vpop.f32.mrb[30].mxu1  ;;  %v4325_v22 = vld [vmem:[#allocation7] ss:$24 sps:$4 sm:$0xff]   ;;  %v4327_v23 = vld [vmem:[#allocation7 + $0x4] ss:$24 sps:$4 sm:$0xff]  }
 0x74d   : > { %v4033_v25 = vpop.f32.mrb[31].mxu1  ;;  %v4328_v24 = vld [vmem:[#allocation7 + $0x10] ss:$24 sps:$4 sm:$0xff]  }
 0x74e   : > { %v4330_v25 = vld [vmem:[#allocation7 + $0x14] ss:$24 sps:$4 sm:$0xff]  }
 0x74f   : > { %2919 = vmatprep.subr.bf16.mxu0 %v4330_v25  ;;  %v4411_v25 = vld [vmem:[#allocation7 + $0x2a4] ss:$24 sps:$4 sm:$0xff]  }
 0x750   : > { %2920 = vmatpush1.bf16.msra.mxu0 %v4328_v24 }
 0x762   : > { %2055 = vrot.lane.b32.xlu0 %v5115_v41, %s4721_s18 }
 0x7d9   : > { %v1936_v26 = vpop.xlane.xlu0 %1935 }
 0x7da   : > { %v1937_v27 = vsub.f32 %v1928_v21, %v1936_v26  ;;  %v4333_v26 = vld [vmem:[#allocation7 + $0x34] ss:$24 sps:$4 sm:$0xff]  }
 0x7dc   : > { %v1938_v28 = vmul.f32 1.442695, %v1937_v27  ;;  %v4336_v27 = vld [vmem:[#allocation7 + $0x44] ss:$24 sps:$4 sm:$0xff]  }
 0x7dd   : > { %v2056_v35 = vpop.permute.xlu0 %2055  ;;  %2921 = vmatprep.subr.bf16.mxu0 %v4336_v27  ;;  %v4412_v27 = vld [vmem:[#allocation7 + $0x2b0] ss:$24 sps:$4 sm:$0xff]  }
 0x7de   : > { %4521 = vpow2.f32 %v1938_v28  ;;  %v2061_v37 = vsel %vm1416_vm9, %v2056_v35, 0  ;;  %v4334_v28 = vld [vmem:[#allocation7 + $0x40] ss:$24 sps:$4 sm:$0xff]   ;;  %v4348_v35 = vld [vmem:[#allocation7 + $0xa4] ss:$24 sps:$4 sm:$0xff]  }
 0x7df   : > { %2922 = vmatpush1.bf16.msra.mxu0 %v4334_v28 }
 0x7e0   : > { %2923 = vmatprep.subr.bf16.mxu0 %v4342_v31  ;;  %v4417_v31 = vld [vmem:[#allocation7 + $0x2d4] ss:$24 sps:$4 sm:$0xff]  }
 0x7e8   : > { %v4522_v30 = vpop.eup %4521 }
 0x7e9   : > { %v1940_v32 = vsel %vm1663_vm14, %v4522_v30, 0.0  ;;  %v1943_v33 = vpack.c.bf16 %v4522_v30, %v4522_v30  ;;  %v4339_v30 = vld [vmem:[#allocation7 + $0x64] ss:$24 sps:$4 sm:$0xff]  }
 0x7ea   : > { %1941 = vadd.xlane.f32.xlu0 %v1940_v32  ;;  %v4337_v32 = vld [vmem:[#allocation7 + $0x60] ss:$24 sps:$4 sm:$0xff]  }
 0x7eb   : > { %4037 = vmatmul.mubr.msk.bf16.vlgmr.msra.gmra.mrb[32].mxu1 %vm1663_vm14, %v1943_v33  ;;  %v4340_v33 = vld [vmem:[#allocation7 + $0x70] ss:$24 sps:$4 sm:$0xff]  }
 0x7ec   : > { %4041 = vmatpush3.bf16.xpose.msra.mxu1 %v2003_v34  ;;  %4042 = vmatprep.mubr.msk.bf16.mxu1 %vm4716_vm3, %v4714_v10  ;;  %v4345_v34 = vld [vmem:[#allocation7 + $0x94] ss:$24 sps:$4 sm:$0xff]  }
 0x7ed   : > { %4046 = vmatprep.subr.bf16.mxu1 %v4714_v10  ;;  %2924 = vmatpush1.bf16.msra.mxu0 %v4340_v33  ;;  %v4418_v33 = vld [vmem:[#allocation7 + $0x2e0] ss:$24 sps:$4 sm:$0xff]  }
 0x7ee   : > { %2925 = vmatprep.subr.bf16.mxu0 %v4348_v35  ;;  %v4423_v35 = vld [vmem:[#allocation7 + $0xc] ss:$24 sps:$4 sm:$0xff]  }
 0x7f3   : > { %4043 = vmatmul.mubr.msk.bf16.vlgmr.msra.gmra.mrb[36].mxu1 %vm1663_vm14, %v1996_v36  ;;  %v4343_v36 = vld [vmem:[#allocation7 + $0x90] ss:$24 sps:$4 sm:$0xff]  }
 0x7f4   : > { %4047 = vmatpush3.bf16.msra.mxu1 %v2061_v37  ;;  %4048 = vmatprep.mubr.msk.bf16.mxu1 %vm4716_vm3, %v4714_v10  ;;  %v4346_v37 = vld [vmem:[#allocation7 + $0xa0] ss:$24 sps:$4 sm:$0xff]  }
 0x7f5   : > { %4052 = vmatprep.subr.bf16.mxu1 %v4714_v10  ;;  %2926 = vmatpush1.bf16.msra.mxu0 %v4346_v37 }
 0x877   : > { %v1942_v57 = vpop.xlane.xlu0 %1941 }
 0x8be   : > { %v1986_v38 = vpop.f32.mrb[32].mxu1 }
 0x8bf   : > { %v4038_v39 = vpop.f32.mrb[33].mxu1 }
 0x8c0   : > { %v1989_v40 = vpop.f32.mrb[34].mxu1  ;;  %v4354_v39 = vld [vmem:[#allocation7 + $0xd4] ss:$24 sps:$4 sm:$0xff]  }
 0x8c1   : > { %v4039_v41 = vpop.f32.mrb[35].mxu1  ;;  %v4349_v40 = vld [vmem:[#allocation7 + $0xc0] ss:$24 sps:$4 sm:$0xff]   ;;  %2927 = vmatprep.subr.bf16.mxu0 %v4354_v39 }
 0x8c2   : > { %v4352_v41 = vld [vmem:[#allocation7 + $0xd0] ss:$24 sps:$4 sm:$0xff]  }
 0x8c3   : > { %2928 = vmatpush1.bf16.msra.mxu0 %v4352_v41 }
 0x8c6   : > { %v2039_v42 = vpop.f32.mrb[36].mxu1 }
 0x8c7   : > { %v4044_v43 = vpop.f32.mrb[37].mxu1  ;;  %v2045_v44 = vsel %vm1663_vm14, %v2039_v42, -inf }
 0x8c8   : > { %2046 = vmax.xlane.f32.xlu1 %v2045_v44  ;;  %v2042_v45 = vpop.f32.mrb[38].mxu1  ;;  %v4360_v43 = vld [vmem:[#allocation7 + $0x104] ss:$24 sps:$4 sm:$0xff]   ;;  %v4355_v44 = vld [vmem:[#allocation7 + $0xf0] ss:$24 sps:$4 sm:$0xff]  }
 0x8c9   : > { %v4045_v46 = vpop.f32.mrb[39].mxu1  ;;  %v4358_v45 = vld [vmem:[#allocation7 + $0x100] ss:$24 sps:$4 sm:$0xff]   ;;  %2929 = vmatprep.subr.bf16.mxu0 %v4360_v43 }
 0x8ca   : > { %v4363_v46 = vld [vmem:[#allocation7 + $0x124] ss:$24 sps:$4 sm:$0xff]   ;;  %2930 = vmatpush1.bf16.msra.mxu0 %v4358_v45 }
 0x8cc   : > { %1829 = vadd.xlane.f32.xlu1 %v1828_v47  ;;  %v4366_v47 = vld [vmem:[#allocation7 + $0x134] ss:$24 sps:$4 sm:$0xff]  }
 0x8cd   : > { %2931 = vmatprep.subr.bf16.mxu0 %v4366_v47 }
 0x955   : > { %v2047_v48 = vpop.xlane.xlu1 %2046 }
 0x956   : > { %v2048_v49 = vsub.f32 %v2039_v42, %v2047_v48  ;;  %v4357_v42 = vld [vmem:[#allocation7 + $0xf4] ss:$24 sps:$4 sm:$0xff]   ;;  %v4361_v48 = vld [vmem:[#allocation7 + $0x120] ss:$24 sps:$4 sm:$0xff]  }
 0x958   : > { %v2049_v50 = vmul.f32 1.442695, %v2048_v49  ;;  %v4364_v49 = vld [vmem:[#allocation7 + $0x130] ss:$24 sps:$4 sm:$0xff]  }
 0x959   : > { %v1830_v53 = vpop.xlane.xlu1 %1829  ;;  %2932 = vmatpush1.bf16.msra.mxu0 %v4364_v49  ;;  %v4421_v49 = vld [vmem:[#allocation7 + $0x8] ss:$24 sps:$4 sm:$0xff]  }
 0x95a   : > { %4523 = vpow2.f32 %v2049_v50  ;;  %v4369_v50 = vld [vmem:[#allocation7 + $0x154] ss:$24 sps:$4 sm:$0xff]  }
 0x95b   : > { %4525 = vrcp.f32 %v1830_v53  ;;  %v4367_v53 = vld [vmem:[#allocation7 + $0x150] ss:$24 sps:$4 sm:$0xff]  }
 0x95c   : > { %4527 = vrcp.f32 %v1942_v57  ;;  %v4373_v57 = vld [vmem:[#allocation7 + $0x180] ss:$24 sps:$4 sm:$0xff]  }
 0x964   : > { %v4524_v51 = vpop.eup %4523 }
 0x965   : > { %v2051_v54 = vsel %vm1663_vm14, %v4524_v51, 0.0  ;;  %v2054_v55 = vpack.c.bf16 %v4524_v51, %v4524_v51  ;;  %v4526_v58 = vpop.eup %4525  ;;  %v4372_v51 = vld [vmem:[#allocation7 + $0x164] ss:$24 sps:$4 sm:$0xff]  }
 0x966   : > { %2052 = vadd.xlane.f32.xlu1 %v2051_v54  ;;  %v1882_v60 = vmul.f32 %v4526_v58, %v1875_v16  ;;  %v4528_v61 = vpop.eup %4527  ;;  %v4370_v54 = vld [vmem:[#allocation7 + $0x160] ss:$24 sps:$4 sm:$0xff]   ;;  %2933 = vmatprep.subr.bf16.mxu0 %v4372_v51  ;;  %v4376_v58 = vld [vmem:[#allocation7 + $0x190] ss:$24 sps:$4 sm:$0xff]  }
 0x967   : > { %4049 = vmatmul.mubr.msk.bf16.vlgmr.msra.gmra.mrb[40].mxu1 %vm1663_vm14, %v2054_v55  ;;  %v1993_v62 = vmul.f32 %v4528_v61, %v1986_v38  ;;  %v4351_v38 = vld [vmem:[#allocation7 + $0xc4] ss:$24 sps:$4 sm:$0xff]   ;;  %2934 = vmatpush1.bf16.msra.mxu0 %v4370_v54 }
 0x968   : > { %4056 = vmatprep.mubr.msk.bf16.mxu1 %vm4716_vm3, %v4714_v10  ;;  %v1883_v63 = vpack.c.bf16 %v1882_v60, %v1882_v60  ;;  %4053 = vmatpush3.bf16.msra.mxu1 %v4323_v1  ;;  %v4375_v55 = vld [vmem:[#allocation7 + $0x184] ss:$24 sps:$4 sm:$0xff]   ;;  %v4381_v60 = vld [vmem:[#allocation7 + $0x1b4] ss:$24 sps:$4 sm:$0xff]  }
 0x969   : > { %v1994_v0 = vpack.c.bf16 %v1993_v62, %v1993_v62  ;;  %4054 = vmatprep.subr.bf16.mxu1 %v4714_v10  ;;  %v4384_v61 = vld [vmem:[#allocation7 + $0x1c4] ss:$24 sps:$4 sm:$0xff]   ;;  %v4379_v62 = vld [vmem:[#allocation7 + $0x1b0] ss:$24 sps:$4 sm:$0xff]   ;;  %v4390_v1 = vld [vmem:[#allocation7 + $0x1f4] ss:$24 sps:$4 sm:$0xff]  }
 0x96a   : > { %1717 = vadd.xlane.f32.xlu1 %v1716_v56  ;;  %v4378_v56 = vld [vmem:[#allocation7 + $0x194] ss:$24 sps:$4 sm:$0xff]  }
 0x96b   : > { %2935 = vmatprep.subr.bf16.mxu0 %v4378_v56  ;;  %v4429_v56 = vld [vmem:[#allocation7 + $0x6c] ss:$24 sps:$4 sm:$0xff]  }
 0x96c   : > { %4055 = vmatpush3.bf16.msra.mxu1 %v4324_v52  ;;  %2936 = vmatpush1.bf16.msra.mxu0 %v4376_v58  ;;  %v4385_v52 = vld [vmem:[#allocation7 + $0x1e0] ss:$24 sps:$4 sm:$0xff]   ;;  %v4432_v58 = vld [vmem:[#allocation7 + $0x9c] ss:$24 sps:$4 sm:$0xff]  }
 0x96d   : > { %2837 = vmatprep.subr.bf16.mxu1 %v4327_v23  ;;  %2937 = vmatprep.subr.bf16.mxu0 %v4384_v61  ;;  %v4408_v23 = vld [vmem:[#allocation7 + $0x284] ss:$24 sps:$4 sm:$0xff]  }
 0x96e   : > { %v4435_v61 = vld [vmem:[#allocation7 + $0xcc] ss:$24 sps:$4 sm:$0xff]  }
 0x97b   : > { %2107 = vrot.lane.b32.xlu1 %v1883_v63, %s4722_s19  ;;  %v4382_v63 = vld [vmem:[#allocation7 + $0x1c0] ss:$24 sps:$4 sm:$0xff]  }
 0x97c   : > { %2938 = vmatpush1.bf16.msra.mxu0 %v4382_v63  ;;  %v4438_v63 = vld [vmem:[#allocation7 + $0xfc] ss:$24 sps:$4 sm:$0xff]  }
 0x97d   : > { %2939 = vmatprep.subr.bf16.mxu0 %v4390_v1  ;;  %v4441_v1 = vld [vmem:[#allocation7 + $0x12c] ss:$24 sps:$4 sm:$0xff]  }
 0x97f   : > { %2110 = vrot.lane.b32.xlu1 %v1994_v0, %s4723_s20  ;;  %v4387_v0 = vld [vmem:[#allocation7 + $0x1e4] ss:$24 sps:$4 sm:$0xff]  }
 0x9f3   : > { %v2053_v2 = vpop.xlane.xlu1 %2052 }
 0x9f4   : > { %4529 = vrcp.f32 %v2053_v2  ;;  %v4388_v2 = vld [vmem:[#allocation7 + $0x1f0] ss:$24 sps:$4 sm:$0xff]  }
 0x9f5   : > { %2940 = vmatpush1.bf16.msra.mxu0 %v4388_v2  ;;  %v4444_v2 = vld [vmem:[#allocation7 + $0x15c] ss:$24 sps:$4 sm:$0xff]  }
 0x9f7   : > { %v1718_v9 = vpop.xlane.xlu1 %1717 }
 0x9f8   : > { %4531 = vrcp.f32 %v1718_v9  ;;  %v3731_v9 = vld [vmem:[%s5283_s8] ss:$0 sm:$0xff] }
 0x9fb   : > { %v2108_v16 = vpop.permute.xlu1 %2107 }
 0x9fe   : > { %v4530_v3 = vpop.eup %4529 }
 0x9ff   : > { %v2111_v18 = vpop.permute.xlu1 %2110 }
 0xa02   : > { %v4532_v11 = vpop.eup %4531 }
 0xa03   : > { %v1768_v12 = vmul.f32 %v4532_v11, %v5140_v59  ;;  %v4331_v59 = vld [vmem:[#allocation7 + $0x30] ss:$24 sps:$4 sm:$0xff]   ;;  %v4402_v11 = vld [vmem:[#allocation7 + $0x254] ss:$24 sps:$4 sm:$0xff]  }
 0xa05   : > { %v1769_v14 = vpack.c.bf16 %v1768_v12, %v1768_v12 }
 0xa07   : > { %v2117_v10 = vsel %vm1663_vm14, %v1769_v14, %v2108_v16 }
 0xa08   : > { %v2120_v19 = vsel %vm2118_vm15, %v2117_v10, %v2111_v18  ;;  %v4405_v10 = vld [vmem:[#allocation7 + $0x274] ss:$24 sps:$4 sm:$0xff]  }
 0xa3a   : > { %v2097_v4 = vpop.f32.mrb[40].mxu1 }
 0xa3b   : > { %v2104_v5 = vmul.f32 %v4530_v3, %v2097_v4  ;;  %v4050_v6 = vpop.f32.mrb[41].mxu1  ;;  %v4393_v3 = vld [vmem:[#allocation7 + $0x214] ss:$24 sps:$4 sm:$0xff]   ;;  %v4391_v4 = vld [vmem:[#allocation7 + $0x210] ss:$24 sps:$4 sm:$0xff]  }
 0xa3c   : > { %v2100_v7 = vpop.f32.mrb[42].mxu1  ;;  %v4396_v6 = vld [vmem:[#allocation7 + $0x224] ss:$24 sps:$4 sm:$0xff]  }
 0xa3d   : > { %v2105_v29 = vpack.c.bf16 %v2104_v5, %v2104_v5  ;;  %v4051_v8 = vpop.f32.mrb[43].mxu1  ;;  %v4394_v5 = vld [vmem:[#allocation7 + $0x220] ss:$24 sps:$4 sm:$0xff]   ;;  %2941 = vmatprep.subr.bf16.mxu0 %v4396_v6  ;;  %v4450_v6 = vld [vmem:[#allocation7 + $0x1bc] ss:$24 sps:$4 sm:$0xff]  }
 0xa3e   : > { %2942 = vmatpush1.bf16.msra.mxu0 %v4394_v5  ;;  %v4397_v7 = vld [vmem:[#allocation7 + $0x240] ss:$24 sps:$4 sm:$0xff]   ;;  %v4400_v8 = vld [vmem:[#allocation7 + $0x250] ss:$24 sps:$4 sm:$0xff]  }
 0xa3f   : > { %2113 = vrot.lane.b32.xlu0 %v2105_v29, %s4724_s30  ;;  %v4399_v29 = vld [vmem:[#allocation7 + $0x244] ss:$24 sps:$4 sm:$0xff]   ;;  %2943 = vmatprep.subr.bf16.mxu0 %v4402_v11  ;;  %v4445_v5 = vld [vmem:[#allocation7 + $0x188] ss:$24 sps:$4 sm:$0xff]   ;;  %v4454_v11 = vld [vmem:[#allocation7 + $0x218] ss:$24 sps:$4 sm:$0xff]  }
 0xa40   : > { %s4633_s30 = sshll.u32 %s4725_s16, 4  ;;  %s4634_s30 = int_to_ptr.vmem [resolvable:$false] %s4633_s30 }
 0xa41   : > { %s4635_s13 = scalar_lea.vmem %s4634_s30, 32 }
 0xa42   : > { %2944 = vmatpush1.bf16.msra.mxu0 %v4400_v8  ;;  %v4451_v8 = vld [vmem:[#allocation7 + $0x1e8] ss:$24 sps:$4 sm:$0xff]  }
 0xa43   : > { %2945 = vmatprep.subr.bf16.mxu0 %v4408_v23  ;;  %v4470_v23 = vld [vmem:[#allocation9] sm:$0xff]  }
 0xab1   : > { %v2114_v20 = vpop.permute.xlu0 %2113 }
 0xab2   : > { %v2123_v21 = vsel %vm2121_vm0, %v2120_v19, %v2114_v20  ;;  %v4403_v19 = vld [vmem:[#allocation7 + $0x270] ss:$24 sps:$4 sm:$0xff]   ;;  %v4406_v20 = vld [vmem:[#allocation7 + $0x280] ss:$24 sps:$4 sm:$0xff]  }
 0xab3   : > { %4057 = vmatmul.mubr.msk.bf16.vlgmr.msra.gmra.mrb[44].mxu1 %vm1483_vm13, %v2123_v21  ;;  %2946 = vmatpush1.bf16.msra.mxu0 %v4406_v20  ;;  %v4468_v20 = vld [vmem:[#allocation7 + $0x2dc] ss:$24 sps:$4 sm:$0xff]  }
 0xab4   : > { %2838 = vmatpush1.bf16.msra.mxu1 %v4325_v22 }
 0xab5   : > { %2839 = vmatprep.subr.bf16.mxu1 %v4333_v26  ;;  %v4409_v26 = vld [vmem:[#allocation7 + $0x2a0] ss:$24 sps:$4 sm:$0xff]  }
 0xab8   : > { %2840 = vmatpush1.bf16.msra.mxu1 %v4331_v59  ;;  %v4414_v59 = vld [vmem:[#allocation7 + $0x2b4] ss:$24 sps:$4 sm:$0xff]  }
 0xab9   : > { %2841 = vmatprep.subr.bf16.mxu1 %v4339_v30  ;;  %2947 = vmatprep.subr.bf16.mxu0 %v4414_v59  ;;  %v4415_v30 = vld [vmem:[#allocation7 + $0x2d0] ss:$24 sps:$4 sm:$0xff]   ;;  %v4475_v59 = vld [vmem:[#allocation9 + $0x58] sm:$0xff]  }
 0xaba   : > { %2948 = vmatpush1.bf16.msra.mxu0 %v4412_v27  ;;  %v4474_v27 = vld [vmem:[#allocation9 + $0x10] sm:$0xff]  }
 0xabc   : > { %2842 = vmatpush1.bf16.msra.mxu1 %v4337_v32  ;;  %v4420_v32 = vld [vmem:[#allocation7 + $0x2e4] ss:$24 sps:$4 sm:$0xff]  }
 0xabd   : > { %2843 = vmatprep.subr.bf16.mxu1 %v4345_v34  ;;  %2949 = vmatprep.subr.bf16.mxu0 %v4420_v32  ;;  %v4479_v32 = vld [vmem:[#allocation9 + $0x68] sm:$0xff]  }
 0xabe   : > { %2950 = vmatpush1.bf16.msra.mxu0 %v4418_v33  ;;  %v4480_v33 = vld [vmem:[#allocation9 + $0x28] sm:$0xff]  }
 0xac0   : > { %2844 = vmatpush1.bf16.msra.mxu1 %v4343_v36 }
 0xac1   : > { %2845 = vmatprep.subr.bf16.mxu1 %v4351_v38 }
 0xac4   : > { %2846 = vmatpush1.bf16.msra.mxu1 %v4349_v40 }
 0xac5   : > { %2847 = vmatprep.subr.bf16.mxu1 %v4357_v42 }
 0xac8   : > { %2848 = vmatpush1.bf16.msra.mxu1 %v4355_v44 }
 0xac9   : > { %2849 = vmatprep.subr.bf16.mxu1 %v4363_v46 }
 0xacc   : > { %2850 = vmatpush1.bf16.msra.mxu1 %v4361_v48 }
 0xacd   : > { %2851 = vmatprep.subr.bf16.mxu1 %v4369_v50 }
 0xad0   : > { %2852 = vmatpush1.bf16.msra.mxu1 %v4367_v53  ;;  %v4426_v53 = vld [vmem:[#allocation7 + $0x3c] ss:$24 sps:$4 sm:$0xff]  }
 0xad1   : > { %2853 = vmatprep.subr.bf16.mxu1 %v4375_v55  ;;  %v4424_v55 = vld [vmem:[#allocation7 + $0x38] ss:$24 sps:$4 sm:$0xff]  }
 0xad4   : > { %2854 = vmatpush1.bf16.msra.mxu1 %v4373_v57  ;;  %v4427_v57 = vld [vmem:[#allocation7 + $0x68] ss:$24 sps:$4 sm:$0xff]  }
 0xad5   : > { %2855 = vmatprep.subr.bf16.mxu1 %v4381_v60  ;;  %v4430_v60 = vld [vmem:[#allocation7 + $0x98] ss:$24 sps:$4 sm:$0xff]  }
 0xad8   : > { %2856 = vmatpush1.bf16.msra.mxu1 %v4379_v62  ;;  %v4433_v62 = vld [vmem:[#allocation7 + $0xc8] ss:$24 sps:$4 sm:$0xff]  }
 0xad9   : > { %2857 = vmatprep.subr.bf16.mxu1 %v4387_v0  ;;  %v4436_v0 = vld [vmem:[#allocation7 + $0xf8] ss:$24 sps:$4 sm:$0xff]  }
 0xadc   : > { %2858 = vmatpush1.bf16.msra.mxu1 %v4385_v52  ;;  %v4439_v52 = vld [vmem:[#allocation7 + $0x128] ss:$24 sps:$4 sm:$0xff]  }
 0xadd   : > { %2859 = vmatprep.subr.bf16.mxu1 %v4393_v3  ;;  %v4442_v3 = vld [vmem:[#allocation7 + $0x158] ss:$24 sps:$4 sm:$0xff]  }
 0xae0   : > { %2860 = vmatpush1.bf16.msra.mxu1 %v4391_v4  ;;  %v4447_v4 = vld [vmem:[#allocation7 + $0x18c] ss:$24 sps:$4 sm:$0xff]  }
 0xae1   : > { %2861 = vmatprep.subr.bf16.mxu1 %v4399_v29  ;;  %v4453_v29 = vld [vmem:[#allocation7 + $0x1ec] ss:$24 sps:$4 sm:$0xff]  }
 0xae4   : > { %2862 = vmatpush1.bf16.msra.mxu1 %v4397_v7  ;;  %v4448_v7 = vld [vmem:[#allocation7 + $0x1b8] ss:$24 sps:$4 sm:$0xff]  }
 0xae5   : > { %2863 = vmatprep.subr.bf16.mxu1 %v4405_v10  ;;  %v4460_v10 = vld [vmem:[#allocation7 + $0x278] ss:$24 sps:$4 sm:$0xff]  }
 0xae8   : > { %2864 = vmatpush1.bf16.msra.mxu1 %v4403_v19  ;;  %v4463_v19 = vld [vmem:[#allocation7 + $0x2a8] ss:$24 sps:$4 sm:$0xff]  }
 0xae9   : > { %2865 = vmatprep.subr.bf16.mxu1 %v4411_v25  ;;  %v4472_v25 = vld [vmem:[#allocation9 + $0x8] sm:$0xff]  }
 0xaec   : > { %2866 = vmatpush1.bf16.msra.mxu1 %v4409_v26  ;;  %v4473_v26 = vld [vmem:[#allocation9 + $0x50] sm:$0xff]  }
 0xaed   : > { %2867 = vmatprep.subr.bf16.mxu1 %v4417_v31  ;;  %v4478_v31 = vld [vmem:[#allocation9 + $0x20] sm:$0xff]  }
 0xaf0   : > { %2868 = vmatpush1.bf16.msra.mxu1 %v4415_v30  ;;  %v4477_v30 = vld [vmem:[#allocation9 + $0x60] sm:$0xff]  }
 0xaf1   : > { %2878 = vmatprep.subr.bf16.mxu1 %v4423_v35  ;;  %v4482_v35 = vld [vmem:[#allocation9 + $0x30] sm:$0xff]  }
 0xb86   : > { %v2183_v12 = vpop.f32.mrb[44].mxu1 }
 0xb87   : > { %v2184_v14 = vadd.f32 %v3731_v9, %v2183_v12  ;;  %v4058_v16 = vpop.f32.mrb[45].mxu1  ;;  %v4456_v9 = vld [vmem:[#allocation7 + $0x21c] ss:$24 sps:$4 sm:$0xff]   ;;  %v4459_v12 = vld [vmem:[#allocation7 + $0x24c] ss:$24 sps:$4 sm:$0xff]  }
 0xb88   : > { %v2186_v18 = vpop.f32.mrb[46].mxu1  ;;  %v4462_v16 = vld [vmem:[#allocation7 + $0x27c] ss:$24 sps:$4 sm:$0xff]  }
 0xb89   : > { %v2189_v21 = vpack.c.bf16 %v2184_v14, %v2184_v14  ;;  %v4059_v22 = vpop.f32.mrb[47].mxu1  ;;  %v4457_v14 = vld [vmem:[#allocation7 + $0x248] ss:$24 sps:$4 sm:$0xff]   ;;  %v4465_v18 = vld [vmem:[#allocation7 + $0x2ac] ss:$24 sps:$4 sm:$0xff]  }
 0xb8a   : > { %v4469_v22 = vld [vmem:[#allocation9 + $0x40] sm:$0xff]  }
 0xb8b   : > { %v2191_v24 = vshrl.u32 %v2189_v21, 16  ;;  %v2206_v28 = vrot.slane %v2189_v21, 3  ;;  %v2196_v34 = vrot.slane %v2189_v21, 1  ;;  %v2202_v42 = vrot.slane %v2189_v21, 2 }
 0xb8d   : > { %2193 = vrot.lane.b32.xlu1 %v2191_v24, %s4718_s14  ;;  %v2203_v36 = vrot.slane %v2191_v24, 2  ;;  %v2209_v37 = vrot.slane %v2191_v24, 3  ;;  %v2199_v38 = vrot.slane %v2191_v24, 1  ;;  %v4471_v24 = vld [vmem:[#allocation9 + $0x48] sm:$0xff]  }
 0xb91   : > { %2207 = vrot.lane.b32.xlu1 %v2206_v28, %s4715_s25  ;;  %v4476_v28 = vld [vmem:[#allocation9 + $0x18] sm:$0xff]  }
 0xb95   : > { %2197 = vrot.lane.b32.xlu1 %v2196_v34, %s4715_s25  ;;  %v4481_v34 = vld [vmem:[#allocation9 + $0x70] sm:$0xff]  }
 0xb99   : > { %2204 = vrot.lane.b32.xlu1 %v2203_v36, %s4718_s14  ;;  %v4483_v36 = vld [vmem:[#allocation9 + $0x78] sm:$0xff]   ;;  %s491_s14 = sand.u32 1, %s4693_s0  }
 0xb9a   : > { %s492_s21 = scalar_lea.vmem [#allocation10], %s491_s14  ;;  %s3479_s26 = scalar_lea.sflag [#allocation6], %s491_s14 }
 0xb9b   : > { %s3491_s18 = sshll.u32 %s492_s21, 4  ;;  %s5235_s18 = int_to_ptr.vmem [resolvable:$true] %s3491_s18 }
 0xb9c   : > { %s4629_s29 = scalar_lea.vmem %s5235_s18, 16  ;;  %p4636_p12 = scmp.lt.s32.totalorder %s5235_s18, %s4634_s30 }
 0xb9d   : > { %2210 = vrot.lane.b32.xlu1 %v2209_v37, %s4717_s23  ;;  %v4484_v37 = vld [vmem:[#allocation9 + $0x38] sm:$0xff]   ;;  %p4630_p6 = scmp.ne.s32.totalorder %s5235_s18, %s4629_s29  ;;  %p4637_p13 = scmp.lt.s32.totalorder %s4635_s13, %s4629_s29 }
 0xb9f   : > { %p4631_p8 = pnand %p4630_p6, %p5327_p7  ;;  %p4638_p2 = por %p4637_p13, %p4636_p12 }
 0xba1   : > { %2200 = vrot.lane.b32.xlu1 %v2199_v38, %s4717_s23  ;;  %v4485_v38 = vld [vmem:[#allocation9 + $0x140] sm:$0xff]   ;;  %p4632_p9 = pneg %p4631_p8 }
 0xba3   : > { %p4639_p4 = pnand %p4638_p2, %p4632_p9 }
 0xbff   : > { %v2194_v39 = vpop.permute.xlu1 %2193 }
 0xc00   : > { %v2213_v48 = vsel %vm1483_vm13, %v2189_v21, %v2194_v39  ;;  %v4466_v21 = vld [vmem:[#allocation7 + $0x2d8] ss:$24 sps:$4 sm:$0xff]   ;;  %v4501_v39 = vld [vmem:[#allocation9 + $0xc0] sm:$0xff]  }
 0xc01   : > { %3936 = vmatprep.subr.bf16.mxu0 %v4501_v39 }
 0xc03   : > { %v2208_v40 = vpop.permute.xlu1 %2207 }
 0xc07   : > { %v2198_v41 = vpop.permute.xlu1 %2197 }
 0xc08   : > { %v2216_v50 = vsel %vm2214_vm2, %v2213_v48, %v2198_v41  ;;  %v4503_v41 = vld [vmem:[#allocation9 + $0xc8] sm:$0xff]   ;;  %v4510_v48 = vld [vmem:[#allocation9 + $0xa0] sm:$0xff]  }
 0xc0b   : > { %v2205_v43 = vpop.permute.xlu1 %2204 }
 0xc0c   : > { %v2223_v44 = vsel %vm1483_vm13, %v2202_v42, %v2205_v43  ;;  %v4504_v42 = vld [vmem:[#allocation9 + $0x88] sm:$0xff]   ;;  %v4505_v43 = vld [vmem:[#allocation9 + $0xd0] sm:$0xff]  }
 0xc0d   : > { %v2225_v46 = vsel %vm2214_vm2, %v2223_v44, %v2208_v40  ;;  %v4502_v40 = vld [vmem:[#allocation9 + $0x80] sm:$0xff]   ;;  %v4506_v44 = vld [vmem:[#allocation9 + $0x90] sm:$0xff]  }
 0xc0f   : > { %v2211_v45 = vpop.permute.xlu1 %2210 }
 0xc10   : > { %v2227_v47 = vsel %vm2217_vm1, %v2225_v46, %v2211_v45  ;;  %v4507_v45 = vld [vmem:[#allocation9 + $0xd8] sm:$0xff]  }
 0xc11   : > { %2869 = vmatprep.mubr.bf16.mxu1 %v2227_v47  ;;  %2951 = vmatprep.mubr.bf16.mxu0 %v2227_v47  ;;  %v4508_v46 = vld [vmem:[#allocation9 + $0x98] sm:$0xff]  }
 0xc13   : > { %v2201_v51 = vpop.permute.xlu1 %2200 }
 0xc14   : > { %v5201_v54 = vsel %vm2217_vm1, %v2216_v50, %v2201_v51  ;;  %v4512_v50 = vld [vmem:[#allocation9 + $0xa8] sm:$0xff]   ;;  %v4513_v51 = vld [vmem:[#allocation9 + $0xf0] sm:$0xff]  }
 0xc15   : > { %2870 = vmatmul.mubr.bf16.vlgmr.msra.gmra.mrb[48].mxu1 %v5201_v54  ;;  %2952 = vmatmul.mubr.bf16.vlgmr.msra.gmra.mrb[4].mxu0 %v5201_v54 }
 0xc16   : > { %2879 = vmatpush1.bf16.msra.mxu1 %v4421_v49  ;;  %2910 = vmatprep.mubr.bf16.mxu1 %v2227_v47  ;;  %v4509_v47 = vld [vmem:[#allocation9 + $0xe0] sm:$0xff]   ;;  %v4511_v49 = vld [vmem:[#allocation9 + $0xe8] sm:$0xff]  }
 0xc17   : > { %2880 = vmatprep.subr.bf16.mxu1 %v4426_v53  ;;  %3937 = vmatpush3.bf16.msra.mxu0 %v4502_v40  ;;  %v4514_v53 = vld [vmem:[#allocation9 + $0xb0] sm:$0xff]  }
 0xc18   : > { %3938 = vmatprep.subr.bf16.mxu0 %v4503_v41 }
 0xc1a   : > { %2881 = vmatpush1.bf16.msra.mxu1 %v4424_v55  ;;  %v4516_v55 = vld [vmem:[#allocation9 + $0xb8] sm:$0xff]  }
 0xc1b   : > { %2882 = vmatprep.subr.bf16.mxu1 %v4429_v56  ;;  %3939 = vmatpush3.bf16.msra.mxu0 %v4504_v42  ;;  %v5209_v56 = vld [vmem:[%s5285_s10] sm:$0x3f] }
 0xc1c   : > { %3940 = vmatprep.subr.bf16.mxu0 %v4505_v43 }
 0xc1e   : > { %2883 = vmatpush1.bf16.msra.mxu1 %v4427_v57  ;;  %v2829_v57 = vsub.s32 5, %v4938_v13 }
 0xc1f   : > { %2884 = vmatprep.subr.bf16.mxu1 %v4432_v58  ;;  %3941 = vmatpush3.bf16.msra.mxu0 %v4506_v44  ;;  %v2810_v58 = vrot.slane %v5209_v56, %v749_v15 }
 0xc20   : > { %3942 = vmatprep.subr.bf16.mxu0 %v4507_v45 }
 0xc22   : > { %2885 = vmatpush1.bf16.msra.mxu1 %v4430_v60  ;;  %v2814_v60 = vrot.slane %v5209_v56, %v753_v17  ;;  %v4487_v17 = vld [vmem:[#allocation9 + $0x148] sm:$0xff]  }
 0xc23   : > { %2886 = vmatprep.subr.bf16.mxu1 %v4435_v61  ;;  %3943 = vmatpush3.bf16.msra.mxu0 %v4508_v46  ;;  %v2830_v61 = vrot.slane %v5209_v56, %v2829_v57 }
 0xc24   : > { %3944 = vmatprep.subr.bf16.mxu0 %v4509_v47 }
 0xc26   : > { %2887 = vmatpush1.bf16.msra.mxu1 %v4433_v62 }
 0xc27   : > { %2888 = vmatprep.subr.bf16.mxu1 %v4438_v63  ;;  %3945 = vmatpush3.bf16.msra.mxu0 %v4510_v48 }
 0xc28   : > { %3946 = vmatprep.subr.bf16.mxu0 %v4511_v49 }
 0xc2a   : > { %2889 = vmatpush1.bf16.msra.mxu1 %v4436_v0 }
 0xc2b   : > { %2890 = vmatprep.subr.bf16.mxu1 %v4441_v1  ;;  %3947 = vmatpush3.bf16.msra.mxu0 %v4512_v50 }
 0xc2c   : > { %3948 = vmatprep.subr.bf16.mxu0 %v4513_v51 }
 0xc2e   : > { %2891 = vmatpush1.bf16.msra.mxu1 %v4439_v52 }
 0xc2f   : > { %2892 = vmatprep.subr.bf16.mxu1 %v4444_v2  ;;  %3949 = vmatpush3.bf16.msra.mxu0 %v4514_v53 }
 0xc32   : > { %2893 = vmatpush1.bf16.msra.mxu1 %v4442_v3 }
 0xc33   : > { %2894 = vmatprep.subr.bf16.mxu1 %v4447_v4 }
 0xc36   : > { %2895 = vmatpush1.bf16.msra.mxu1 %v4445_v5 }
 0xc37   : > { %2896 = vmatprep.subr.bf16.mxu1 %v4450_v6 }
 0xc3a   : > { %2897 = vmatpush1.bf16.msra.mxu1 %v4448_v7 }
 0xc3b   : > { %2898 = vmatprep.subr.bf16.mxu1 %v4453_v29 }
 0xc3e   : > { %2899 = vmatpush1.bf16.msra.mxu1 %v4451_v8 }
 0xc3f   : > { %2900 = vmatprep.subr.bf16.mxu1 %v4456_v9 }
 0xc42   : > { %2901 = vmatpush1.bf16.msra.mxu1 %v4454_v11  ;;  %v4486_v11 = vld [vmem:[#allocation9 + $0x100] sm:$0xff]  }
 0xc43   : > { %2902 = vmatprep.subr.bf16.mxu1 %v4459_v12 }
 0xc46   : > { %2903 = vmatpush1.bf16.msra.mxu1 %v4457_v14 }
 0xc47   : > { %2904 = vmatprep.subr.bf16.mxu1 %v4462_v16  ;;  %v4488_v16 = vld [vmem:[#allocation9 + $0x108] sm:$0xff]  }
 0xc4a   : > { %2905 = vmatpush1.bf16.msra.mxu1 %v4460_v10  ;;  %v4489_v10 = vld [vmem:[#allocation9 + $0x150] sm:$0xff]  }
 0xc4b   : > { %2906 = vmatprep.subr.bf16.mxu1 %v4465_v18  ;;  %v4490_v18 = vld [vmem:[#allocation9 + $0x110] sm:$0xff]  }
 0xc4e   : > { %2907 = vmatpush1.bf16.msra.mxu1 %v4463_v19  ;;  %v4491_v19 = vld [vmem:[#allocation9 + $0x158] sm:$0xff]  }
 0xc4f   : > { %2908 = vmatprep.subr.bf16.mxu1 %v4468_v20  ;;  %v4492_v20 = vld [vmem:[#allocation9 + $0x118] sm:$0xff]  }
 0xc52   : > { %2909 = vmatpush1.bf16.msra.mxu1 %v4466_v21  ;;  %v4493_v21 = vld [vmem:[#allocation9 + $0x160] sm:$0xff]  }
 0xc53   : > { %3914 = vmatprep.subr.bf16.mxu1 %v4469_v22  ;;  %v4494_v22 = vld [vmem:[#allocation9 + $0x120] sm:$0xff]  }
 0xc55   : > { %2911 = vmatmul.mubr.bf16.vlgmr.msra.gmra.mrb[52].mxu1 %v5201_v54  ;;  %v4515_v54 = vld [vmem:[#allocation9 + $0xf8] sm:$0xff]  }
 0xc56   : > { %3915 = vmatpush3.bf16.msra.mxu1 %v4470_v23  ;;  %3950 = vmatprep.subr.bf16.mxu0 %v4515_v54  ;;  %v2825_v23 = vsub.s32 4, %v4938_v13 }
 0xc57   : > { %3916 = vmatprep.subr.bf16.mxu1 %v4471_v24  ;;  %3951 = vmatpush3.bf16.msra.mxu0 %v4516_v55  ;;  %v4495_v24 = vld [vmem:[#allocation9 + $0x168] sm:$0xff]  }
 0xc5a   : > { %3917 = vmatpush3.bf16.msra.mxu1 %v4472_v25  ;;  %v4496_v25 = vld [vmem:[#allocation9 + $0x128] sm:$0xff]  }
 0xc5b   : > { %3918 = vmatprep.subr.bf16.mxu1 %v4473_v26  ;;  %v2826_v26 = vrot.slane %v5209_v56, %v2825_v23 }
 0xc5e   : > { %3919 = vmatpush3.bf16.msra.mxu1 %v4474_v27  ;;  %v4497_v27 = vld [vmem:[#allocation9 + $0x170] sm:$0xff]  }
 0xc5f   : > { %3920 = vmatprep.subr.bf16.mxu1 %v4475_v59  ;;  %v4498_v59 = vld [vmem:[#allocation9 + $0x130] sm:$0xff]  }
 0xc62   : > { %3921 = vmatpush3.bf16.msra.mxu1 %v4476_v28 }
 0xc63   : > { %3922 = vmatprep.subr.bf16.mxu1 %v4477_v30  ;;  %v4499_v30 = vld [vmem:[#allocation9 + $0x178] sm:$0xff]  }
 0xc66   : > { %3923 = vmatpush3.bf16.msra.mxu1 %v4478_v31  ;;  %v4500_v31 = vld [vmem:[#allocation9 + $0x138] sm:$0xff]  }
 0xc67   : > { %3924 = vmatprep.subr.bf16.mxu1 %v4479_v32 }
 0xc6a   : > { %3925 = vmatpush3.bf16.msra.mxu1 %v4480_v33 }
 0xc6b   : > { %3926 = vmatprep.subr.bf16.mxu1 %v4481_v34  ;;  %v2817_v34 = vsub.s32 2, %v4938_v13 }
 0xc6e   : > { %3927 = vmatpush3.bf16.msra.mxu1 %v4482_v35  ;;  %v2821_v35 = vsub.s32 3, %v4938_v13 }
 0xc6f   : > { %3928 = vmatprep.subr.bf16.mxu1 %v4483_v36  ;;  %v2818_v36 = vrot.slane %v5209_v56, %v2817_v34 }
 0xc72   : > { %3929 = vmatpush3.bf16.msra.mxu1 %v4484_v37  ;;  %v2822_v37 = vrot.slane %v5209_v56, %v2821_v35 }
 0xc73   : > { %3958 = vmatprep.subr.bf16.mxu1 %v4485_v38 }
 0xce8   : > { %v2871_v62 = vpop.f32.mrb[48].mxu1  ;;  %v2953_v63 = vpop.f32.mrb[4].mxu0 }
 0xce9   : > { %v2872_v0 = vadd.f32 %v2871_v62, %v2810_v58  ;;  %v2873_v1 = vpop.f32.mrb[49].mxu1  ;;  %v2955_v52 = vpop.f32.mrb[5].mxu0  ;;  %v2954_v28 = vadd.f32 %v2953_v63, %v2826_v26  ;;  %v3068_v58 = vld [vmem:[%s5287_s12] sm:$0x1] }
 0xcea   : > { %v2874_v2 = vadd.f32 %v2873_v1, %v2814_v60  ;;  %v2956_v3 = vadd.f32 %v2955_v52, %v2830_v61  ;;  %v2875_v4 = vpop.f32.mrb[50].mxu1  ;;  %v2957_v5 = vpop.f32.mrb[6].mxu0 }
 0xceb   : > { %v2960_v6 = vmax.f32 %v2872_v0, 0.0  ;;  %v2876_v7 = vpop.f32.mrb[51].mxu1  ;;  %v2958_v29 = vpop.f32.mrb[7].mxu0  ;;  %v2964_v32 = vmax.f32 %v2954_v28, 0.0 }
 0xcec   : > { %v2961_v8 = vmax.f32 %v2874_v2, 0.0  ;;  %v2965_v15 = vmax.f32 %v2956_v3, 0.0 }
 0xced   : > { %v2966_v12 = vpack.c.bf16 %v2960_v6, %v2960_v6  ;;  %v2970_v33 = vpack.c.bf16 %v2964_v32, %v2964_v32 }
 0xcee   : > { %v2967_v9 = vpack.c.bf16 %v2961_v8, %v2961_v8  ;;  %v2971_v14 = vpack.c.bf16 %v2965_v15, %v2965_v15 }
 0xcf0   : > { %3389 = vmatprep.mubr.bf16.mxu1 %v2967_v9 }
 0xcf1   : > { %3390 = vmatmul.mubr.bf16.vlgmr.msra.gmra.mrb[56].mxu1 %v2966_v12 }
 0xcf2   : > { %3959 = vmatpush3.bf16.msra.mxu1 %v4486_v11  ;;  %3469 = vmatprep.mubr.bf16.mxu1 %v2971_v14 }
 0xcf3   : > { %3960 = vmatprep.subr.bf16.mxu1 %v4487_v17 }
 0xcf6   : > { %3961 = vmatpush3.bf16.msra.mxu1 %v4488_v16 }
 0xcf7   : > { %3962 = vmatprep.subr.bf16.mxu1 %v4489_v10 }
 0xcfa   : > { %3963 = vmatpush3.bf16.msra.mxu1 %v4490_v18 }
 0xcfb   : > { %3964 = vmatprep.subr.bf16.mxu1 %v4491_v19 }
 0xcfe   : > { %3965 = vmatpush3.bf16.msra.mxu1 %v4492_v20 }
 0xcff   : > { %3966 = vmatprep.subr.bf16.mxu1 %v4493_v21 }
 0xd02   : > { %3967 = vmatpush3.bf16.msra.mxu1 %v4494_v22 }
 0xd03   : > { %3968 = vmatprep.subr.bf16.mxu1 %v4495_v24 }
 0xd06   : > { %3969 = vmatpush3.bf16.msra.mxu1 %v4496_v25 }
 0xd07   : > { %3970 = vmatprep.subr.bf16.mxu1 %v4497_v27 }
 0xd0a   : > { %3971 = vmatpush3.bf16.msra.mxu1 %v4498_v59 }
 0xd0b   : > { %3972 = vmatprep.subr.bf16.mxu1 %v4499_v30 }
 0xd0e   : > { %3973 = vmatpush3.bf16.msra.mxu1 %v4500_v31 }
 0xd11   : > { %3470 = vmatmul.mubr.bf16.vlgmr.msra.gmra.mrb[60].mxu1 %v2970_v33 }
 0xd28   : > { %v2912_v38 = vpop.f32.mrb[52].mxu1 }
 0xd29   : > { %v2913_v39 = vadd.f32 %v2912_v38, %v2818_v36  ;;  %v2914_v40 = vpop.f32.mrb[53].mxu1 }
 0xd2a   : > { %v2915_v41 = vadd.f32 %v2914_v40, %v2822_v37  ;;  %v2916_v42 = vpop.f32.mrb[54].mxu1 }
 0xd2b   : > { %v2962_v43 = vmax.f32 %v2913_v39, 0.0  ;;  %v2917_v44 = vpop.f32.mrb[55].mxu1 }
 0xd2c   : > { %v2963_v45 = vmax.f32 %v2915_v41, 0.0 }
 0xd2d   : > { %v2968_v47 = vpack.c.bf16 %v2962_v43, %v2962_v43 }
 0xd2e   : > { %v2969_v46 = vpack.c.bf16 %v2963_v45, %v2963_v45 }
 0xd30   : > { %3429 = vmatprep.mubr.bf16.mxu0 %v2969_v46 }
 0xd31   : > { %3430 = vmatmul.mubr.bf16.vlgmr.msra.gmra.mrb[8].mxu0 %v2968_v47 }
 0xdc4   : > { %v3930_v48 = vpop.f32.mrb[56].mxu1 }
 0xdc5   : > { %v3931_v49 = vpop.f32.mrb[57].mxu1 }
 0xdc6   : > { %v3932_v13 = vadd.f32 %v3931_v49, %v3930_v48  ;;  %v3933_v50 = vpop.f32.mrb[58].mxu1 }
 0xdc7   : > { %v3934_v51 = vpop.f32.mrb[59].mxu1 }
 0xdc8   : > { %v3392_v62 = vadd.f32 %v3932_v13, %v3068_v58 }
 0xde4   : > { %v3974_v53 = vpop.f32.mrb[60].mxu1 }
 0xde5   : > { %v3975_v54 = vpop.f32.mrb[61].mxu1 }
 0xde6   : > { %v3976_v55 = vadd.f32 %v3975_v54, %v3974_v53  ;;  %v3977_v56 = vpop.f32.mrb[62].mxu1 }
 0xde7   : > { %v3978_v57 = vpop.f32.mrb[63].mxu1 }
 0xe04   : > { %v3952_v60 = vpop.f32.mrb[8].mxu0 }
 0xe05   : > { %v3953_v61 = vpop.f32.mrb[9].mxu0 }
 0xe06   : > { %v3954_v63 = vadd.f32 %v3953_v61, %v3952_v60  ;;  %v3955_v0 = vpop.f32.mrb[10].mxu0 }
 0xe07   : > { %v3956_v1 = vpop.f32.mrb[11].mxu0 }
 0xe08   : > { %v3432_v52 = vadd.f32 %v3954_v63, %v3392_v62 }
 0xe0a   : > { %v3472_v2 = vadd.f32 %v3976_v55, %v3432_v52 }
 0xe0c   : > { %3477 = vst [vmem:[%s492_s21] sm:$0x1] %v3472_v2 }
 0xe0d   : > { %4642 = shalt.err (!%p4639_p4)
}
 0xe0e   : > { %s4643_s15 = scalar_lea.hbm %s5233_s17, 16  ;;  %s4647_s14 = scalar_lea.hbm %s5326_s28, 32 }
 0xe0f   : > { %p4644_p10 = scmp.ne.s32.totalorder %s5233_s17, %s4643_s15  ;;  %p4648_p0 = scmp.lt.u32.totalorder %s5233_s17, %s5326_s28 }
 0xe10   : > { %p4649_p3 = scmp.lt.u32.totalorder %s4647_s14, %s4643_s15  ;;  %p4651_p6 = scmp.lt.u32.totalorder %s4643_s15, %s5233_s17 }
 0xe11   : > { %p4645_p5 = pnand %p4644_p10, %p5327_p7 }
 0xe12   : > { %p4650_p1 = por %p4649_p3, %p4648_p0 }
 0xe13   : > { %p4646_p11 = pneg %p4645_p5 }
 0xe14   : > { %p4652_p8 = por %p4651_p6, %p4650_p1 }
 0xe16   : > { %p4653_p9 = pnand %p4652_p8, %p4646_p11 }
 0xe18   : > { %4656 = shalt.err (!%p4653_p9)
}
 0xe19   : > { %4084 = dma.vmem_to_hbm [thread:$0]  (%p5327_p7), %s5235_s18, 16, %s5233_s17, %s3479_s26  }
 0xe1a PF: > { %s5328_s24 = sld [smem:[#allocation17_spill]]  ;;  %s5329_s21 = sld [smem:[#allocation15_spill]] }
 0xe1b   : > { %s5330_s19 = sld [smem:[#allocation20_spill]] }
 0xe20   : > { %p4106_p12 = scmp.ge.s32.totalorder %s5328_s24, 2  ;;  %s3503_s20 = sand.u32 1, %s5329_s21  }
 0xe21   : > { %p5331_p13 = scmp.ne.s32.totalorder %s5330_s19, 0  ;;  %s3504_s29 = scalar_lea.sflag [#allocation6], %s3503_s20 }
 0xe23   : > { %p4097_p2 = pnand %p4106_p12, %p5331_p13 }
 0xe25   : > { %4684 = dma.done.wait (!%p4097_p2), %s3504_s29, 16  }
 0xe26   : > { %4686 = vsyncadd (!%p4097_p2), %s3504_s29, 4294967280  ;;  %s5332_s15 = sld [smem:[#allocation18_spill]]  ;;  %s5333_s16 = sld [smem:[#allocation16_spill]] }
 0xe27   : > { %s5334_s14 = sld [smem:[#allocation19_spill]]  ;;  %s5335_s30 = smov %s4693_s0 }
 0xe2c   : > { %p31_p4 = scmp.ge.s32.totalorder %s5332_s15, 4   ;;  %s5336_s0 = smov %s5333_s16 }
 0xe2e   :  { %33 = sbr.rel (!%p31_p4) target bundleno = 21 (0x15), region = 123 }
 0xe35   :  { %3508 = vsyncpa [#allocation5], 1 }
 0xe36   :  { %3510 = vsyncpa [#allocation5 + $0x1], 1 }
 0xe37   :  { %3511 = vsyncpa [#allocation8], 1 }
 0xe38   :  { %3512 = vsyncpa [#allocation6], 1 }
 0xe39   :  { %3514 = vsyncpa [#allocation6 + $0x1], 1 }

</bundles_post_ra>
